<compile_context>
chip_gen: v7x
topology: tpu7x:2x2x1
jax: 0.10.0
libtpu: 0.0.40
codegen_flags: <defaults>
</compile_context>

<pallas_src>
import functools
import numpy as np
import jax
import jax.numpy as jnp
from jax import lax
from jax.experimental import pallas as pl
from jax.experimental.pallas import tpu as pltpu

NEG_SLOPE = 0.01          # nn.LeakyReLU default
GEN_EPS = 1e-7            # GENConv message eps
LN_EPS = 1e-5             # gnn.LayerNorm eps
VMEM_LIMIT = 32 * 1024 * 1024


def _vmem(n):
    return [pl.BlockSpec(memory_space=pltpu.MemorySpace.VMEM) for _ in range(n)]


def _bdot(a, b):
    """MXU matmul: bf16 operands, f32 accumulation."""
    return jnp.dot(a.astype(jnp.bfloat16), b.astype(jnp.bfloat16),
                   preferred_element_type=jnp.float32)


def _leaky(x):
    # max(x, 0.01*x): valid for slope < 1, one mul + one max (fewer VALU ops).
    return jnp.maximum(x, NEG_SLOPE * x)


def _graph_ln(x, B, Bt, norm):
    # gnn.LayerNorm(mode='graph', affine=False): mean/var over all nodes of a graph AND all
    # channels; norm = (#nodes in graph) * C.  Kept in f32 (tiny matmuls) so the second
    # moment matches the f32 PyTorch reference.
    s = jnp.dot(B, x, preferred_element_type=jnp.float32)                # (G, D)
    mean = jnp.sum(s, axis=-1, keepdims=True) / norm                     # (G, 1)
    xc = x - jnp.dot(Bt, mean, preferred_element_type=jnp.float32)       # broadcast to nodes
    s2 = jnp.dot(B, xc * xc, preferred_element_type=jnp.float32)
    var = jnp.sum(s2, axis=-1, keepdims=True) / norm
    inv = lax.rsqrt(var + LN_EPS)                                        # EUP
    return xc * jnp.dot(Bt, inv, preferred_element_type=jnp.float32)


# ----------------------------- embedding kernel -----------------------------

def _embed_kernel(*refs, n_lin):
    # refs = x, e, c, [w,b]*n_lin (x2h), [w,b]*n_lin (e2h), [w,b]*n_lin (c2h), o_out, e_out, c_out
    x_ref, e_ref, c_ref = refs[0:3]
    nw = 2 * n_lin
    wsets = [refs[3 + i * nw: 3 + (i + 1) * nw] for i in range(3)]
    outs = refs[3 + 3 * nw: 6 + 3 * nw]

    def run_mlp(h, ws):
        # LeakyReLU after every Linear except the last (same as the `mlp` helper).
        for i in range(n_lin):
            h = _bdot(h, ws[2 * i][...]) + ws[2 * i + 1][...]
            if i < n_lin - 1:
                h = _leaky(h)
        return h

    for inp, ws, out in zip((x_ref, e_ref, c_ref), wsets, outs):
        out[...] = run_mlp(inp[...], ws)


def run_embed(x, edge_attr, cond, params, D):
    wb = []
    for name in ("x2h", "e2h", "c2h"):
        for (w, b) in params[name]:
            wb += [w.astype(jnp.bfloat16), b]          # weights bf16 once, biases f32
    n_lin = len(params["x2h"])
    out_shape = (jax.ShapeDtypeStruct((x.shape[0], D), jnp.float32),
                 jax.ShapeDtypeStruct((edge_attr.shape[0], D), jnp.float32),
                 jax.ShapeDtypeStruct((cond.shape[0], D), jnp.float32))
    return pl.pallas_call(
        functools.partial(_embed_kernel, n_lin=n_lin),
        out_shape=out_shape,
        in_specs=_vmem(3 + len(wb)),
        out_specs=tuple(pl.BlockSpec(memory_space=pltpu.MemorySpace.VMEM) for _ in range(3)),
        compiler_params=pltpu.CompilerParams(vmem_limit_bytes=VMEM_LIMIT),
    )(x, edge_attr, cond, *wb)


# ------------------------- fused layer-stack kernel -------------------------

def _stack_kernel(o0_ref, e_ref, gsrc_ref, sdst_ref, bm_ref, bt_ref, norm_ref,
                  bn_ref, bnt_ref, cnt_ref, sv_ref, c_ref,
                  wtop_ref, wbot_ref, bqkv_ref, wedge_ref, wlin_ref, blin_ref,
                  wff1_ref, bff1_ref, wff2_ref, bff2_ref,
                  node_ref, graph_ref, o_sc,
                  *, heads, ch, n_real):
    l = pl.program_id(0)
    HD = heads * ch

    @pl.when(l == 0)
    def _():
        o_sc[...] = o0_ref[...]

    o = o_sc[...]            # (Na, D) f32, carried across the layer grid axis
    e = e_ref[...]           # (E, D)  f32
    gsrc = gsrc_ref[...]     # (E, Na) bf16 one-hot gather-of-source
    sdst = sdst_ref[...]     # (Na, E) bf16 one-hot scatter-to-dst (also the attention mask)

    # ---- GENConv(aggr='add', norm=None): genw already folded into the projection ----
    #   msg_e = relu(x_src(e) + edge_attr_e) + eps ; agg_raw_i = sum_{dst(e)=i} msg_e
    x_src = _bdot(gsrc, o)
    msg = jnp.maximum(x_src + e, 0.0) + GEN_EPS
    agg = _bdot(sdst, msg)                                       # (Na, D)

    # ---- fused q|k|v|skip projection (genw folded on host: see _pack_layers) ----
    qkvs = _bdot(o, wtop_ref[...]) + _bdot(agg, wbot_ref[...]) + bqkv_ref[...]   # (Na, 4HD)
    q = qkvs[:, 0:HD]
    k = qkvs[:, HD:2 * HD]
    v = qkvs[:, 2 * HD:3 * HD]
    skip = qkvs[:, 3 * HD:4 * HD]

    eproj = _bdot(e, wedge_ref[...])                             # (E, HD)
    k_src = _bdot(gsrc, k) + eproj                               # (E, HD) gathered + edge
    v_src = _bdot(gsrc, v) + eproj

    # ---- TransformerConv attention; nn.Linear(H*D, D) folded into the head loop ----
    wlin = wlin_ref[...]                                         # (HD, D) bf16
    scale = 1.0 / float(np.sqrt(ch))
    acc = _bdot(skip, wlin) + blin_ref[...]                      # skip + bias contribution
    for h in range(heads):
        lo, hi = h * ch, (h + 1) * ch
        logits = lax.dot_general(q[:, lo:hi].astype(jnp.bfloat16),
                                 k_src[:, lo:hi].astype(jnp.bfloat16),
                                 (((1,), (1,)), ((), ())),
                                 preferred_element_type=jnp.float32) * scale   # (Na, E)
        logits = jnp.where(sdst > 0.5, logits, jnp.float32(-1e30))
        m = jnp.max(logits, axis=-1, keepdims=True)
        p = jnp.exp(logits - m)                                  # masked entries underflow to 0
        denom = jnp.sum(p, axis=-1, keepdims=True)               # >= 1 (self-loops) -> no floor
        p = p * pl.reciprocal(denom, approx=True)
        acc = acc + _bdot(_bdot(p, v_src[:, lo:hi]), wlin[lo:hi, :])

    # ---- residual + graph LayerNorm, feed-forward, residual + graph LayerNorm ----
    B = bm_ref[...]
    Bt = bt_ref[...]
    nrm = norm_ref[...]
    o1 = _graph_ln(o + acc, B, Bt, nrm)
    h1 = _leaky(_bdot(o1, wff1_ref[...]) + bff1_ref[...])
    ff = _bdot(h1, wff2_ref[...]) + bff2_ref[...]
    o_new = _graph_ln(o1 + ff, B, Bt, nrm)
    o_sc[...] = o_new

    # ---- readout fused into the last layer step ----
    @pl.when(l == pl.num_programs(0) - 1)
    def _():
        c = c_ref[...]                                            # (G, D) embedded cond
        pooled = _bdot(bn_ref[...], o_new) / cnt_ref[...]         # mean pool over real nodes
        virt = jnp.dot(sv_ref[...], o_new,
                       preferred_element_type=jnp.float32)        # exact gather of virtual rows
        graph_ref[...] = jnp.concatenate([pooled, virt, c], axis=1)
        c_per_node = jnp.dot(bnt_ref[...], c,
                             preferred_element_type=jnp.float32)  # exact c[batch] gather
        node_ref[...] = jnp.concatenate([o_new[:n_real, :], c_per_node], axis=1)


def run_stack(o0, aug_e, gsrc, sdst, Bm, Bt, ln_norm, Bn, Bnt, cnt, Sv, c,
              stacked, D, H, n_real):
    L = stacked[0].shape[0]
    Na = o0.shape[0]
    E = aug_e.shape[0]
    G = c.shape[0]
    HD = H * D

    const_arrs = (o0, aug_e, gsrc, sdst, Bm, Bt, ln_norm, Bn, Bnt, cnt, Sv, c)
    const_specs = [pl.BlockSpec(tuple(a.shape), lambda l: (0, 0)) for a in const_arrs]
    layer_specs = [pl.BlockSpec((None,) + tuple(w.shape[1:]), lambda l: (l, 0, 0))
                   for w in stacked]

    grid_spec = pltpu.PrefetchScalarGridSpec(
        num_scalar_prefetch=0,
        grid=(L,),
        in_specs=const_specs + layer_specs,
        out_specs=(pl.BlockSpec((n_real, 2 * D), lambda l: (0, 0)),
                   pl.BlockSpec((G, 3 * D), lambda l: (0, 0))),
        scratch_shapes=[pltpu.VMEM((Na, D), jnp.float32)])

    flops = int(2 * L * (2 * E * Na * D            # GENConv gather + scatter
                         + 2 * Na * D * 4 * HD     # fused q|k|v|skip projections
                         + E * D * HD              # edge projection
                         + 2 * E * Na * HD         # k/v source gathers
                         + 2 * H * Na * E * D      # logits + p @ v
                         + Na * HD * D             # attn/skip through wlin
                         + 8 * Na * D * D          # feed-forward
                         + 4 * G * Na * D))        # graph layer-norm segment sums
    transcendentals = int(L * H * Na * E)
    bytes_accessed = int(sum(int(np.prod(a.shape)) * a.dtype.itemsize
                             for a in const_arrs + tuple(stacked))
                         + n_real * 2 * D * 4 + G * 3 * D * 4)

    return pl.pallas_call(
        functools.partial(_stack_kernel, heads=H, ch=D, n_real=n_real),
        grid_spec=grid_spec,
        out_shape=(jax.ShapeDtypeStruct((n_real, 2 * D), jnp.float32),
                   jax.ShapeDtypeStruct((G, 3 * D), jnp.float32)),
        compiler_params=pltpu.CompilerParams(
            dimension_semantics=("arbitrary",),
            vmem_limit_bytes=VMEM_LIMIT),
        cost_estimate=pl.CostEstimate(flops=flops, transcendentals=transcendentals,
                                      bytes_accessed=bytes_accessed),
    )(*const_arrs, *stacked)


# --------------------------- model parameters ---------------------------

def init_params(key, x_dim, e_dim, g_dim, num_emb, num_layers, num_heads):
    D, H = num_emb, num_heads
    keys = iter(jax.random.split(key, 512))

    def lin(fi, fo, bias=True):
        w = jax.random.normal(next(keys), (fi, fo), jnp.float32) / np.sqrt(fi)
        if bias:
            b = jax.random.normal(next(keys), (1, fo), jnp.float32) * 0.01
        else:
            b = jnp.zeros((1, fo), jnp.float32)
        return w, b

    def mlp_params(n_in, n_hid, n_out, n_layer):
        dims = [n_in] + [n_hid] * n_layer + [n_out]
        return [lin(dims[i], dims[i + 1]) for i in range(len(dims) - 1)]

    params = {
        "x2h": mlp_params(x_dim, D, D, 2),
        "e2h": mlp_params(e_dim, D, D, 2),
        "c2h": mlp_params(g_dim, D, D, 2),
        "layers": [],
    }
    for _ in range(num_layers):
        gen_w, _ = lin(D, D, bias=False)                 # GENConv internal MLP (bias=False)
        w_qkvs, b_qkvs = lin(2 * D, 4 * H * D)           # fused lin_q | lin_k | lin_v | lin_skip
        wedge, _ = lin(D, H * D, bias=False)             # TransformerConv.lin_edge (no bias)
        wlin, blin = lin(H * D, D)                       # nn.Linear(H*D, D)
        wff1, bff1 = lin(D, 4 * D)                       # ff mlp: D -> 4D -> D
        wff2, bff2 = lin(4 * D, D)
        params["layers"].append(dict(
            gen_w=gen_w, w_qkvs=w_qkvs, b_qkvs=b_qkvs, wedge=wedge,
            wlin=wlin, blin=blin, wff1=wff1, bff1=bff1, wff2=wff2, bff2=bff2))
    return params


def _pack_layers(params, D, H):
    """Stack per-layer weights on a leading layer axis, fold genw into the fused
    projection in f32, and cast weight matrices (not biases) to bf16."""
    tops, bots, bqs, wes, wls, bls, w1s, b1s, w2s, b2s = ([] for _ in range(10))
    for lp in params["layers"]:
        top = lp["w_qkvs"][:D]                 # (D, 4HD) acts on o
        bot = lp["w_qkvs"][D:]                 # (D, 4HD) acts on GENConv output
        botg = jnp.dot(lp["gen_w"], bot)       # f32 composition: genw @ bot
        tops.append(top + botg)
        bots.append(botg)
        bqs.append(lp["b_qkvs"])
        wes.append(lp["wedge"])
        wls.append(lp["wlin"])
        bls.append(lp["blin"])
        w1s.append(lp["wff1"])
        b1s.append(lp["bff1"])
        w2s.append(lp["wff2"])
        b2s.append(lp["bff2"])
    bf = lambda xs: jnp.stack(xs).astype(jnp.bfloat16)
    f32 = lambda xs: jnp.stack(xs)
    return (bf(tops), bf(bots), f32(bqs), bf(wes), bf(wls), f32(bls),
            bf(w1s), f32(b1s), bf(w2s), f32(b2s))


# ------------------------------ forward pass ------------------------------

def graph_transformer_forward(params, x, edge_attr, edge_index, batch, cond,
                              num_emb, num_heads):
    N = x.shape[0]
    G = cond.shape[0]
    Na = N + G
    D = num_emb
    H = num_heads

    # fused input MLPs (one pallas_call)
    o, e, c = run_embed(x, edge_attr, cond, params, D)

    # --- augmented graph construction (plain-JAX glue, mirrors the PyTorch forward) ---
    u = jnp.arange(N, dtype=jnp.int32)
    v = batch.astype(jnp.int32) + N
    src0 = jnp.concatenate([edge_index[0].astype(jnp.int32), u, v])
    dst0 = jnp.concatenate([edge_index[1].astype(jnp.int32), v, u])
    e_p = jnp.zeros((2 * N, D), jnp.float32).at[:, 0].set(1.0)
    aug_e0 = jnp.concatenate([e, e_p], axis=0)

    # add_self_loops(..., fill_value='mean'): self-loop attr = mean of incoming edge attrs
    deg = jnp.zeros((Na,), jnp.float32).at[dst0].add(1.0)
    loop_attr = (jnp.zeros((Na, D), jnp.float32).at[dst0].add(aug_e0)
                 / jnp.maximum(deg, 1.0)[:, None])
    loop = jnp.arange(Na, dtype=jnp.int32)
    src = jnp.concatenate([src0, loop])
    dst = jnp.concatenate([dst0, loop])
    aug_e = jnp.concatenate([aug_e0, loop_attr], axis=0)

    aug_batch = jnp.concatenate([batch.astype(jnp.int32),
                                 jnp.arange(G, dtype=jnp.int32)])
    o0 = jnp.concatenate([o, c], axis=0)                       # (Na, D)

    # dense incidence / segment matrices feeding the Pallas kernel (0/1 -> exact in bf16)
    gsrc = jax.nn.one_hot(src, Na, dtype=jnp.bfloat16)         # (E, Na) gather of source nodes
    sdst = jax.nn.one_hot(dst, Na, dtype=jnp.bfloat16).T       # (Na, E) scatter-add / attn mask
    Bm = jax.nn.one_hot(aug_batch, G, dtype=jnp.float32).T     # (G, Na) graph-LN segments (f32)
    Bt = Bm.T                                                  # (Na, G)
    ln_norm = jnp.maximum(jnp.sum(Bm, axis=1, keepdims=True), 1.0) * D

    # readout helpers (also resident in the fused kernel)
    Bn = jnp.concatenate([jax.nn.one_hot(batch, G, dtype=jnp.bfloat16).T,
                          jnp.zeros((G, G), jnp.bfloat16)], axis=1)     # (G, Na) real-node pool
    Bnt = jax.nn.one_hot(batch, G, dtype=jnp.float32)                   # (N, G) exact c gather
    cnt = jnp.maximum(jnp.sum(Bn.astype(jnp.float32), axis=1, keepdims=True), 1.0)
    Sv = jax.nn.one_hot(N + jnp.arange(G, dtype=jnp.int32), Na,
                        dtype=jnp.float32)                              # (G, Na) virtual rows

    stacked = _pack_layers(params, D, H)

    # one fused pallas_call for ALL layers + readout (grid=(num_layers,), o in VMEM scratch)
    node_out, graph_out = run_stack(o0, aug_e, gsrc, sdst, Bm, Bt, ln_norm,
                                    Bn, Bnt, cnt, Sv, c, stacked, D, H, N)
    return node_out, graph_out


# ------------------------------------ main ------------------------------------

if __name__ == "__main__":
    X_DIM, E_DIM, G_DIM = 8, 4, 6
    NUM_EMB, NUM_LAYERS, NUM_HEADS = 32, 3, 2

    key = jax.random.PRNGKey(0)
    kp, kx, ke, kc = jax.random.split(key, 4)
    params = init_params(kp, X_DIM, E_DIM, G_DIM, NUM_EMB, NUM_LAYERS, NUM_HEADS)

    # Small 2-graph batch: graph 0 has 5 nodes (ring-ish), graph 1 has 4 nodes (path).
    edge_list = [(0, 1), (1, 0), (1, 2), (2, 1), (2, 3), (3, 2), (3, 4), (4, 3),
                 (0, 4), (4, 0),
                 (5, 6), (6, 5), (6, 7), (7, 6), (7, 8), (8, 7)]
    edge_index = jnp.asarray(np.array(edge_list, dtype=np.int32).T)   # (2, 16)
    batch = jnp.array([0] * 5 + [1] * 4, dtype=jnp.int32)             # (9,)
    x = jax.random.normal(kx, (9, X_DIM), jnp.float32)
    edge_attr = jax.random.normal(ke, (16, E_DIM), jnp.float32)
    cond = jax.random.normal(kc, (2, G_DIM), jnp.float32)

    fwd = jax.jit(functools.partial(graph_transformer_forward,
                                    num_emb=NUM_EMB, num_heads=NUM_HEADS))
    node_emb, graph_emb = fwd(params, x, edge_attr, edge_index, batch, cond)
    jax.block_until_ready((node_emb, graph_emb))

    assert node_emb.shape == (9, NUM_EMB * 2), node_emb.shape
    assert graph_emb.shape == (2, NUM_EMB * 3), graph_emb.shape
    assert np.all(np.isfinite(np.asarray(node_emb)))
    assert np.all(np.isfinite(np.asarray(graph_emb)))
    print("KERNEL_OK")
</pallas_src>

<mosaic_0001>
module attributes {stable_mosaic.version = 11 : i64} {
  func.func @_embed_kernel(%arg0: memref<9x8xf32, #tpu.memory_space<vmem>>, %arg1: memref<16x4xf32, #tpu.memory_space<vmem>>, %arg2: memref<2x6xf32, #tpu.memory_space<vmem>>, %arg3: memref<8x32xbf16, #tpu.memory_space<vmem>>, %arg4: memref<1x32xf32, #tpu.memory_space<vmem>>, %arg5: memref<32x32xbf16, #tpu.memory_space<vmem>>, %arg6: memref<1x32xf32, #tpu.memory_space<vmem>>, %arg7: memref<32x32xbf16, #tpu.memory_space<vmem>>, %arg8: memref<1x32xf32, #tpu.memory_space<vmem>>, %arg9: memref<4x32xbf16, #tpu.memory_space<vmem>>, %arg10: memref<1x32xf32, #tpu.memory_space<vmem>>, %arg11: memref<32x32xbf16, #tpu.memory_space<vmem>>, %arg12: memref<1x32xf32, #tpu.memory_space<vmem>>, %arg13: memref<32x32xbf16, #tpu.memory_space<vmem>>, %arg14: memref<1x32xf32, #tpu.memory_space<vmem>>, %arg15: memref<6x32xbf16, #tpu.memory_space<vmem>>, %arg16: memref<1x32xf32, #tpu.memory_space<vmem>>, %arg17: memref<32x32xbf16, #tpu.memory_space<vmem>>, %arg18: memref<1x32xf32, #tpu.memory_space<vmem>>, %arg19: memref<32x32xbf16, #tpu.memory_space<vmem>>, %arg20: memref<1x32xf32, #tpu.memory_space<vmem>>, %arg21: memref<9x32xf32, #tpu.memory_space<vmem>>, %arg22: memref<16x32xf32, #tpu.memory_space<vmem>>, %arg23: memref<2x32xf32, #tpu.memory_space<vmem>>) attributes {dimension_semantics = [], scalar_prefetch = 0 : i64, scratch_operands = 0 : i64, tpu.core_type = #tpu.core_type<tc>} {
    %c0 = arith.constant 0 : index
    %c0_0 = arith.constant 0 : index
    %0 = vector.load %arg0[%c0, %c0_0] : memref<9x8xf32, #tpu.memory_space<vmem>>, vector<9x8xf32>
    %c0_1 = arith.constant 0 : index
    %c0_2 = arith.constant 0 : index
    %1 = vector.load %arg3[%c0_1, %c0_2] : memref<8x32xbf16, #tpu.memory_space<vmem>>, vector<8x32xbf16>
    %2 = arith.truncf %0 : vector<9x8xf32> to vector<9x8xbf16>
    %cst = arith.constant dense<0.000000e+00> : vector<9x32xf32>
    %3 = tpu.matmul %2, %1, %cst {dimension_numbers = #tpu.dot_dimension_numbers<[1], [0], [0], [1], [0, 0, 1, 1], [], []>} : vector<9x8xbf16>, vector<8x32xbf16>, vector<9x32xf32> -> vector<9x32xf32>
    %c0_3 = arith.constant 0 : index
    %c0_4 = arith.constant 0 : index
    %4 = vector.load %arg4[%c0_3, %c0_4] : memref<1x32xf32, #tpu.memory_space<vmem>>, vector<1x32xf32>
    %5 = vector.broadcast %4 : vector<1x32xf32> to vector<9x32xf32>
    %6 = arith.addf %3, %5 : vector<9x32xf32>
    %cst_5 = arith.constant 0.00999999977 : f32
    %7 = vector.broadcast %cst_5 : f32 to vector<9x32xf32>
    %8 = arith.mulf %7, %6 : vector<9x32xf32>
    %9 = arith.maximumf %6, %8 : vector<9x32xf32>
    %c0_6 = arith.constant 0 : index
    %c0_7 = arith.constant 0 : index
    %10 = vector.load %arg5[%c0_6, %c0_7] : memref<32x32xbf16, #tpu.memory_space<vmem>>, vector<32x32xbf16>
    %11 = arith.truncf %9 : vector<9x32xf32> to vector<9x32xbf16>
    %cst_8 = arith.constant dense<0.000000e+00> : vector<9x32xf32>
    %12 = tpu.matmul %11, %10, %cst_8 {dimension_numbers = #tpu.dot_dimension_numbers<[1], [0], [0], [1], [0, 0, 1, 1], [], []>} : vector<9x32xbf16>, vector<32x32xbf16>, vector<9x32xf32> -> vector<9x32xf32>
    %c0_9 = arith.constant 0 : index
    %c0_10 = arith.constant 0 : index
    %13 = vector.load %arg6[%c0_9, %c0_10] : memref<1x32xf32, #tpu.memory_space<vmem>>, vector<1x32xf32>
    %14 = vector.broadcast %13 : vector<1x32xf32> to vector<9x32xf32>
    %15 = arith.addf %12, %14 : vector<9x32xf32>
    %cst_11 = arith.constant 0.00999999977 : f32
    %16 = vector.broadcast %cst_11 : f32 to vector<9x32xf32>
    %17 = arith.mulf %16, %15 : vector<9x32xf32>
    %18 = arith.maximumf %15, %17 : vector<9x32xf32>
    %c0_12 = arith.constant 0 : index
    %c0_13 = arith.constant 0 : index
    %19 = vector.load %arg7[%c0_12, %c0_13] : memref<32x32xbf16, #tpu.memory_space<vmem>>, vector<32x32xbf16>
    %20 = arith.truncf %18 : vector<9x32xf32> to vector<9x32xbf16>
    %cst_14 = arith.constant dense<0.000000e+00> : vector<9x32xf32>
    %21 = tpu.matmul %20, %19, %cst_14 {dimension_numbers = #tpu.dot_dimension_numbers<[1], [0], [0], [1], [0, 0, 1, 1], [], []>} : vector<9x32xbf16>, vector<32x32xbf16>, vector<9x32xf32> -> vector<9x32xf32>
    %c0_15 = arith.constant 0 : index
    %c0_16 = arith.constant 0 : index
    %22 = vector.load %arg8[%c0_15, %c0_16] : memref<1x32xf32, #tpu.memory_space<vmem>>, vector<1x32xf32>
    %23 = vector.broadcast %22 : vector<1x32xf32> to vector<9x32xf32>
    %24 = arith.addf %21, %23 : vector<9x32xf32>
    %c0_17 = arith.constant 0 : index
    %c0_18 = arith.constant 0 : index
    %25 = vector.load %arg21[%c0_17, %c0_18] : memref<9x32xf32, #tpu.memory_space<vmem>>, vector<9x32xf32>
    tpu.vector_store %arg21[%c0_17, %c0_18], %24 {strides = array<i32>} : memref<9x32xf32, #tpu.memory_space<vmem>>, vector<9x32xf32>,
    %c0_19 = arith.constant 0 : index
    %c0_20 = arith.constant 0 : index
    %26 = vector.load %arg1[%c0_19, %c0_20] : memref<16x4xf32, #tpu.memory_space<vmem>>, vector<16x4xf32>
    %c0_21 = arith.constant 0 : index
    %c0_22 = arith.constant 0 : index
    %27 = vector.load %arg9[%c0_21, %c0_22] : memref<4x32xbf16, #tpu.memory_space<vmem>>, vector<4x32xbf16>
    %28 = arith.truncf %26 : vector<16x4xf32> to vector<16x4xbf16>
    %cst_23 = arith.constant dense<0.000000e+00> : vector<16x32xf32>
    %29 = tpu.matmul %28, %27, %cst_23 {dimension_numbers = #tpu.dot_dimension_numbers<[1], [0], [0], [1], [0, 0, 1, 1], [], []>} : vector<16x4xbf16>, vector<4x32xbf16>, vector<16x32xf32> -> vector<16x32xf32>
    %c0_24 = arith.constant 0 : index
    %c0_25 = arith.constant 0 : index
    %30 = vector.load %arg10[%c0_24, %c0_25] : memref<1x32xf32, #tpu.memory_space<vmem>>, vector<1x32xf32>
    %31 = vector.broadcast %30 : vector<1x32xf32> to vector<16x32xf32>
    %32 = arith.addf %29, %31 : vector<16x32xf32>
    %cst_26 = arith.constant 0.00999999977 : f32
    %33 = vector.broadcast %cst_26 : f32 to vector<16x32xf32>
    %34 = arith.mulf %33, %32 : vector<16x32xf32>
    %35 = arith.maximumf %32, %34 : vector<16x32xf32>
    %c0_27 = arith.constant 0 : index
    %c0_28 = arith.constant 0 : index
    %36 = vector.load %arg11[%c0_27, %c0_28] : memref<32x32xbf16, #tpu.memory_space<vmem>>, vector<32x32xbf16>
    %37 = arith.truncf %35 : vector<16x32xf32> to vector<16x32xbf16>
    %cst_29 = arith.constant dense<0.000000e+00> : vector<16x32xf32>
    %38 = tpu.matmul %37, %36, %cst_29 {dimension_numbers = #tpu.dot_dimension_numbers<[1], [0], [0], [1], [0, 0, 1, 1], [], []>} : vector<16x32xbf16>, vector<32x32xbf16>, vector<16x32xf32> -> vector<16x32xf32>
    %c0_30 = arith.constant 0 : index
    %c0_31 = arith.constant 0 : index
    %39 = vector.load %arg12[%c0_30, %c0_31] : memref<1x32xf32, #tpu.memory_space<vmem>>, vector<1x32xf32>
    %40 = vector.broadcast %39 : vector<1x32xf32> to vector<16x32xf32>
    %41 = arith.addf %38, %40 : vector<16x32xf32>
    %cst_32 = arith.constant 0.00999999977 : f32
    %42 = vector.broadcast %cst_32 : f32 to vector<16x32xf32>
    %43 = arith.mulf %42, %41 : vector<16x32xf32>
    %44 = arith.maximumf %41, %43 : vector<16x32xf32>
    %c0_33 = arith.constant 0 : index
    %c0_34 = arith.constant 0 : index
    %45 = vector.load %arg13[%c0_33, %c0_34] : memref<32x32xbf16, #tpu.memory_space<vmem>>, vector<32x32xbf16>
    %46 = arith.truncf %44 : vector<16x32xf32> to vector<16x32xbf16>
    %cst_35 = arith.constant dense<0.000000e+00> : vector<16x32xf32>
    %47 = tpu.matmul %46, %45, %cst_35 {dimension_numbers = #tpu.dot_dimension_numbers<[1], [0], [0], [1], [0, 0, 1, 1], [], []>} : vector<16x32xbf16>, vector<32x32xbf16>, vector<16x32xf32> -> vector<16x32xf32>
    %c0_36 = arith.constant 0 : index
    %c0_37 = arith.constant 0 : index
    %48 = vector.load %arg14[%c0_36, %c0_37] : memref<1x32xf32, #tpu.memory_space<vmem>>, vector<1x32xf32>
    %49 = vector.broadcast %48 : vector<1x32xf32> to vector<16x32xf32>
    %50 = arith.addf %47, %49 : vector<16x32xf32>
    %c0_38 = arith.constant 0 : index
    %c0_39 = arith.constant 0 : index
    %51 = vector.load %arg22[%c0_38, %c0_39] : memref<16x32xf32, #tpu.memory_space<vmem>>, vector<16x32xf32>
    tpu.vector_store %arg22[%c0_38, %c0_39], %50 {strides = array<i32>} : memref<16x32xf32, #tpu.memory_space<vmem>>, vector<16x32xf32>,
    %c0_40 = arith.constant 0 : index
    %c0_41 = arith.constant 0 : index
    %52 = vector.load %arg2[%c0_40, %c0_41] : memref<2x6xf32, #tpu.memory_space<vmem>>, vector<2x6xf32>
    %c0_42 = arith.constant 0 : index
    %c0_43 = arith.constant 0 : index
    %53 = vector.load %arg15[%c0_42, %c0_43] : memref<6x32xbf16, #tpu.memory_space<vmem>>, vector<6x32xbf16>
    %54 = arith.truncf %52 : vector<2x6xf32> to vector<2x6xbf16>
    %cst_44 = arith.constant dense<0.000000e+00> : vector<2x32xf32>
    %55 = tpu.matmul %54, %53, %cst_44 {dimension_numbers = #tpu.dot_dimension_numbers<[1], [0], [0], [1], [0, 0, 1, 1], [], []>} : vector<2x6xbf16>, vector<6x32xbf16>, vector<2x32xf32> -> vector<2x32xf32>
    %c0_45 = arith.constant 0 : index
    %c0_46 = arith.constant 0 : index
    %56 = vector.load %arg16[%c0_45, %c0_46] : memref<1x32xf32, #tpu.memory_space<vmem>>, vector<1x32xf32>
    %57 = vector.broadcast %56 : vector<1x32xf32> to vector<2x32xf32>
    %58 = arith.addf %55, %57 : vector<2x32xf32>
    %cst_47 = arith.constant 0.00999999977 : f32
    %59 = vector.broadcast %cst_47 : f32 to vector<2x32xf32>
    %60 = arith.mulf %59, %58 : vector<2x32xf32>
    %61 = arith.maximumf %58, %60 : vector<2x32xf32>
    %c0_48 = arith.constant 0 : index
    %c0_49 = arith.constant 0 : index
    %62 = vector.load %arg17[%c0_48, %c0_49] : memref<32x32xbf16, #tpu.memory_space<vmem>>, vector<32x32xbf16>
    %63 = arith.truncf %61 : vector<2x32xf32> to vector<2x32xbf16>
    %cst_50 = arith.constant dense<0.000000e+00> : vector<2x32xf32>
    %64 = tpu.matmul %63, %62, %cst_50 {dimension_numbers = #tpu.dot_dimension_numbers<[1], [0], [0], [1], [0, 0, 1, 1], [], []>} : vector<2x32xbf16>, vector<32x32xbf16>, vector<2x32xf32> -> vector<2x32xf32>
    %c0_51 = arith.constant 0 : index
    %c0_52 = arith.constant 0 : index
    %65 = vector.load %arg18[%c0_51, %c0_52] : memref<1x32xf32, #tpu.memory_space<vmem>>, vector<1x32xf32>
    %66 = vector.broadcast %65 : vector<1x32xf32> to vector<2x32xf32>
    %67 = arith.addf %64, %66 : vector<2x32xf32>
    %cst_53 = arith.constant 0.00999999977 : f32
    %68 = vector.broadcast %cst_53 : f32 to vector<2x32xf32>
    %69 = arith.mulf %68, %67 : vector<2x32xf32>
    %70 = arith.maximumf %67, %69 : vector<2x32xf32>
    %c0_54 = arith.constant 0 : index
    %c0_55 = arith.constant 0 : index
    %71 = vector.load %arg19[%c0_54, %c0_55] : memref<32x32xbf16, #tpu.memory_space<vmem>>, vector<32x32xbf16>
    %72 = arith.truncf %70 : vector<2x32xf32> to vector<2x32xbf16>
    %cst_56 = arith.constant dense<0.000000e+00> : vector<2x32xf32>
    %73 = tpu.matmul %72, %71, %cst_56 {dimension_numbers = #tpu.dot_dimension_numbers<[1], [0], [0], [1], [0, 0, 1, 1], [], []>} : vector<2x32xbf16>, vector<32x32xbf16>, vector<2x32xf32> -> vector<2x32xf32>
    %c0_57 = arith.constant 0 : index
    %c0_58 = arith.constant 0 : index
    %74 = vector.load %arg20[%c0_57, %c0_58] : memref<1x32xf32, #tpu.memory_space<vmem>>, vector<1x32xf32>
    %75 = vector.broadcast %74 : vector<1x32xf32> to vector<2x32xf32>
    %76 = arith.addf %73, %75 : vector<2x32xf32>
    %c0_59 = arith.constant 0 : index
    %c0_60 = arith.constant 0 : index
    %77 = vector.load %arg23[%c0_59, %c0_60] : memref<2x32xf32, #tpu.memory_space<vmem>>, vector<2x32xf32>
    tpu.vector_store %arg23[%c0_59, %c0_60], %76 {strides = array<i32>} : memref<2x32xf32, #tpu.memory_space<vmem>>, vector<2x32xf32>,
    return
  }
}

module attributes {stable_mosaic.version = 11 : i64} {
  func.func @_stack_kernel(%arg0: i32, %arg1: memref<11x32xf32, #tpu.memory_space<vmem>>, %arg2: memref<45x32xf32, #tpu.memory_space<vmem>>, %arg3: memref<45x11xbf16, #tpu.memory_space<vmem>>, %arg4: memref<11x45xbf16, #tpu.memory_space<vmem>>, %arg5: memref<2x11xf32, #tpu.memory_space<vmem>>, %arg6: memref<11x2xf32, #tpu.memory_space<vmem>>, %arg7: memref<2x1xf32, #tpu.memory_space<vmem>>, %arg8: memref<2x11xbf16, #tpu.memory_space<vmem>>, %arg9: memref<9x2xf32, #tpu.memory_space<vmem>>, %arg10: memref<2x1xf32, #tpu.memory_space<vmem>>, %arg11: memref<2x11xf32, #tpu.memory_space<vmem>>, %arg12: memref<2x32xf32, #tpu.memory_space<vmem>>, %arg13: memref<1x32x256xbf16, #tpu.memory_space<vmem>>, %arg14: memref<1x32x256xbf16, #tpu.memory_space<vmem>>, %arg15: memref<1x1x256xf32, #tpu.memory_space<vmem>>, %arg16: memref<1x32x64xbf16, #tpu.memory_space<vmem>>, %arg17: memref<1x64x32xbf16, #tpu.memory_space<vmem>>, %arg18: memref<1x1x32xf32, #tpu.memory_space<vmem>>, %arg19: memref<1x32x128xbf16, #tpu.memory_space<vmem>>, %arg20: memref<1x1x128xf32, #tpu.memory_space<vmem>>, %arg21: memref<1x128x32xbf16, #tpu.memory_space<vmem>>, %arg22: memref<1x1x32xf32, #tpu.memory_space<vmem>>, %arg23: memref<9x64xf32, #tpu.memory_space<vmem>>, %arg24: memref<2x96xf32, #tpu.memory_space<vmem>>, %arg25: memref<11x32xf32, #tpu.memory_space<vmem>>) attributes {dimension_semantics = [#tpu.dimension_semantics<arbitrary>], iteration_bounds = array<i64: 3>, scalar_prefetch = 0 : i64, scratch_operands = 1 : i64, tpu.core_type = #tpu.core_type<tc>, window_params = [{pipeline_mode = #tpu.pipeline_mode<synchronous>, transform_indices = @transform_0, window_bounds = array<i64: 11, 32>}, {pipeline_mode = #tpu.pipeline_mode<synchronous>, transform_indices = @transform_1, window_bounds = array<i64: 45, 32>}, {pipeline_mode = #tpu.pipeline_mode<synchronous>, transform_indices = @transform_2, window_bounds = array<i64: 45, 11>}, {pipeline_mode = #tpu.pipeline_mode<synchronous>, transform_indices = @transform_3, window_bounds = array<i64: 11, 45>}, {pipeline_mode = #tpu.pipeline_mode<synchronous>, transform_indices = @transform_4, window_bounds = array<i64: 2, 11>}, {pipeline_mode = #tpu.pipeline_mode<synchronous>, transform_indices = @transform_5, window_bounds = array<i64: 11, 2>}, {pipeline_mode = #tpu.pipeline_mode<synchronous>, transform_indices = @transform_6, window_bounds = array<i64: 2, 1>}, {pipeline_mode = #tpu.pipeline_mode<synchronous>, transform_indices = @transform_7, window_bounds = array<i64: 2, 11>}, {pipeline_mode = #tpu.pipeline_mode<synchronous>, transform_indices = @transform_8, window_bounds = array<i64: 9, 2>}, {pipeline_mode = #tpu.pipeline_mode<synchronous>, transform_indices = @transform_9, window_bounds = array<i64: 2, 1>}, {pipeline_mode = #tpu.pipeline_mode<synchronous>, transform_indices = @transform_10, window_bounds = array<i64: 2, 11>}, {pipeline_mode = #tpu.pipeline_mode<synchronous>, transform_indices = @transform_11, window_bounds = array<i64: 2, 32>}, {transform_indices = @transform_12, window_bounds = array<i64: 1, 32, 256>}, {transform_indices = @transform_13, window_bounds = array<i64: 1, 32, 256>}, {transform_indices = @transform_14, window_bounds = array<i64: 1, 1, 256>}, {transform_indices = @transform_15, window_bounds = array<i64: 1, 32, 64>}, {transform_indices = @transform_16, window_bounds = array<i64: 1, 64, 32>}, {transform_indices = @transform_17, window_bounds = array<i64: 1, 1, 32>}, {transform_indices = @transform_18, window_bounds = array<i64: 1, 32, 128>}, {transform_indices = @transform_19, window_bounds = array<i64: 1, 1, 128>}, {transform_indices = @transform_20, window_bounds = array<i64: 1, 128, 32>}, {transform_indices = @transform_21, window_bounds = array<i64: 1, 1, 32>}, {pipeline_mode = #tpu.pipeline_mode<synchronous>, transform_indices = @transform_22, window_bounds = array<i64: 9, 64>}, {pipeline_mode = #tpu.pipeline_mode<synchronous>, transform_indices = @transform_23, window_bounds = array<i64: 2, 96>}]} {
    %c0_i32 = arith.constant 0 : i32
    %0 = arith.cmpi eq, %arg0, %c0_i32 : i32
    %1 = arith.extui %0 : i1 to i32
    %c0_i32_0 = arith.constant 0 : i32
    %2 = arith.cmpi ne, %1, %c0_i32_0 : i32
    scf.if %2 {
      %c0_89 = arith.constant 0 : index
      %c0_90 = arith.constant 0 : index
      %173 = vector.load %arg1[%c0_89, %c0_90] : memref<11x32xf32, #tpu.memory_space<vmem>>, vector<11x32xf32>
      %c0_91 = arith.constant 0 : index
      %c0_92 = arith.constant 0 : index
      %174 = vector.load %arg25[%c0_91, %c0_92] : memref<11x32xf32, #tpu.memory_space<vmem>>, vector<11x32xf32>
      tpu.vector_store %arg25[%c0_91, %c0_92], %173 {strides = array<i32>} : memref<11x32xf32, #tpu.memory_space<vmem>>, vector<11x32xf32>,
    } else {
    }
    %c0 = arith.constant 0 : index
    %c0_1 = arith.constant 0 : index
    %3 = vector.load %arg25[%c0, %c0_1] : memref<11x32xf32, #tpu.memory_space<vmem>>, vector<11x32xf32>
    %c0_2 = arith.constant 0 : index
    %c0_3 = arith.constant 0 : index
    %4 = vector.load %arg2[%c0_2, %c0_3] : memref<45x32xf32, #tpu.memory_space<vmem>>, vector<45x32xf32>
    %c0_4 = arith.constant 0 : index
    %c0_5 = arith.constant 0 : index
    %5 = vector.load %arg3[%c0_4, %c0_5] : memref<45x11xbf16, #tpu.memory_space<vmem>>, vector<45x11xbf16>
    %c0_6 = arith.constant 0 : index
    %c0_7 = arith.constant 0 : index
    %6 = vector.load %arg4[%c0_6, %c0_7] : memref<11x45xbf16, #tpu.memory_space<vmem>>, vector<11x45xbf16>
    %7 = arith.truncf %3 : vector<11x32xf32> to vector<11x32xbf16>
    %cst = arith.constant dense<0.000000e+00> : vector<45x32xf32>
    %8 = tpu.matmul %5, %7, %cst {dimension_numbers = #tpu.dot_dimension_numbers<[1], [0], [0], [1], [0, 0, 1, 1], [], []>} : vector<45x11xbf16>, vector<11x32xbf16>, vector<45x32xf32> -> vector<45x32xf32>
    %9 = arith.addf %8, %4 : vector<45x32xf32>
    %cst_8 = arith.constant 0.000000e+00 : f32
    %10 = vector.broadcast %cst_8 : f32 to vector<45x32xf32>
    %11 = arith.maximumf %9, %10 : vector<45x32xf32>
    %cst_9 = arith.constant 1.000000e-07 : f32
    %12 = vector.broadcast %cst_9 : f32 to vector<45x32xf32>
    %13 = arith.addf %11, %12 : vector<45x32xf32>
    %14 = arith.truncf %13 : vector<45x32xf32> to vector<45x32xbf16>
    %cst_10 = arith.constant dense<0.000000e+00> : vector<11x32xf32>
    %15 = tpu.matmul %6, %14, %cst_10 {dimension_numbers = #tpu.dot_dimension_numbers<[1], [0], [0], [1], [0, 0, 1, 1], [], []>} : vector<11x45xbf16>, vector<45x32xbf16>, vector<11x32xf32> -> vector<11x32xf32>
    %c0_11 = arith.constant 0 : index
    %c0_12 = arith.constant 0 : index
    %c0_13 = arith.constant 0 : index
    %16 = vector.load %arg13[%c0_11, %c0_12, %c0_13] : memref<1x32x256xbf16, #tpu.memory_space<vmem>>, vector<1x32x256xbf16>
    %17 = vector.shape_cast %16 : vector<1x32x256xbf16> to vector<32x256xbf16>
    %18 = arith.truncf %3 : vector<11x32xf32> to vector<11x32xbf16>
    %cst_14 = arith.constant dense<0.000000e+00> : vector<11x256xf32>
    %19 = tpu.matmul %18, %17, %cst_14 {dimension_numbers = #tpu.dot_dimension_numbers<[1], [0], [0], [1], [0, 0, 1, 1], [], []>} : vector<11x32xbf16>, vector<32x256xbf16>, vector<11x256xf32> -> vector<11x256xf32>
    %c0_15 = arith.constant 0 : index
    %c0_16 = arith.constant 0 : index
    %c0_17 = arith.constant 0 : index
    %20 = vector.load %arg14[%c0_15, %c0_16, %c0_17] : memref<1x32x256xbf16, #tpu.memory_space<vmem>>, vector<1x32x256xbf16>
    %21 = vector.shape_cast %20 : vector<1x32x256xbf16> to vector<32x256xbf16>
    %22 = arith.truncf %15 : vector<11x32xf32> to vector<11x32xbf16>
    %cst_18 = arith.constant dense<0.000000e+00> : vector<11x256xf32>
    %23 = tpu.matmul %22, %21, %cst_18 {dimension_numbers = #tpu.dot_dimension_numbers<[1], [0], [0], [1], [0, 0, 1, 1], [], []>} : vector<11x32xbf16>, vector<32x256xbf16>, vector<11x256xf32> -> vector<11x256xf32>
    %24 = arith.addf %19, %23 : vector<11x256xf32>
    %c0_19 = arith.constant 0 : index
    %c0_20 = arith.constant 0 : index
    %c0_21 = arith.constant 0 : index
    %25 = vector.load %arg15[%c0_19, %c0_20, %c0_21] : memref<1x1x256xf32, #tpu.memory_space<vmem>>, vector<1x1x256xf32>
    %26 = vector.shape_cast %25 : vector<1x1x256xf32> to vector<1x256xf32>
    %27 = vector.broadcast %26 : vector<1x256xf32> to vector<11x256xf32>
    %28 = arith.addf %24, %27 : vector<11x256xf32>
    %29 = vector.extract_strided_slice %28 {offsets = [0, 0], sizes = [11, 64], strides = [1, 1]} : vector<11x256xf32> to vector<11x64xf32>
    %30 = vector.extract_strided_slice %28 {offsets = [0, 64], sizes = [11, 64], strides = [1, 1]} : vector<11x256xf32> to vector<11x64xf32>
    %31 = vector.extract_strided_slice %28 {offsets = [0, 128], sizes = [11, 64], strides = [1, 1]} : vector<11x256xf32> to vector<11x64xf32>
    %32 = vector.extract_strided_slice %28 {offsets = [0, 192], sizes = [11, 64], strides = [1, 1]} : vector<11x256xf32> to vector<11x64xf32>
    %c0_22 = arith.constant 0 : index
    %c0_23 = arith.constant 0 : index
    %c0_24 = arith.constant 0 : index
    %33 = vector.load %arg16[%c0_22, %c0_23, %c0_24] : memref<1x32x64xbf16, #tpu.memory_space<vmem>>, vector<1x32x64xbf16>
    %34 = vector.shape_cast %33 : vector<1x32x64xbf16> to vector<32x64xbf16>
    %35 = arith.truncf %4 : vector<45x32xf32> to vector<45x32xbf16>
    %cst_25 = arith.constant dense<0.000000e+00> : vector<45x64xf32>
    %36 = tpu.matmul %35, %34, %cst_25 {dimension_numbers = #tpu.dot_dimension_numbers<[1], [0], [0], [1], [0, 0, 1, 1], [], []>} : vector<45x32xbf16>, vector<32x64xbf16>, vector<45x64xf32> -> vector<45x64xf32>
    %37 = arith.truncf %30 : vector<11x64xf32> to vector<11x64xbf16>
    %cst_26 = arith.constant dense<0.000000e+00> : vector<45x64xf32>
    %38 = tpu.matmul %5, %37, %cst_26 {dimension_numbers = #tpu.dot_dimension_numbers<[1], [0], [0], [1], [0, 0, 1, 1], [], []>} : vector<45x11xbf16>, vector<11x64xbf16>, vector<45x64xf32> -> vector<45x64xf32>
    %39 = arith.addf %38, %36 : vector<45x64xf32>
    %40 = arith.truncf %31 : vector<11x64xf32> to vector<11x64xbf16>
    %cst_27 = arith.constant dense<0.000000e+00> : vector<45x64xf32>
    %41 = tpu.matmul %5, %40, %cst_27 {dimension_numbers = #tpu.dot_dimension_numbers<[1], [0], [0], [1], [0, 0, 1, 1], [], []>} : vector<45x11xbf16>, vector<11x64xbf16>, vector<45x64xf32> -> vector<45x64xf32>
    %42 = arith.addf %41, %36 : vector<45x64xf32>
    %c0_28 = arith.constant 0 : index
    %c0_29 = arith.constant 0 : index
    %c0_30 = arith.constant 0 : index
    %43 = vector.load %arg17[%c0_28, %c0_29, %c0_30] : memref<1x64x32xbf16, #tpu.memory_space<vmem>>, vector<1x64x32xbf16>
    %44 = vector.shape_cast %43 : vector<1x64x32xbf16> to vector<64x32xbf16>
    %45 = arith.truncf %32 : vector<11x64xf32> to vector<11x64xbf16>
    %cst_31 = arith.constant dense<0.000000e+00> : vector<11x32xf32>
    %46 = tpu.matmul %45, %44, %cst_31 {dimension_numbers = #tpu.dot_dimension_numbers<[1], [0], [0], [1], [0, 0, 1, 1], [], []>} : vector<11x64xbf16>, vector<64x32xbf16>, vector<11x32xf32> -> vector<11x32xf32>
    %c0_32 = arith.constant 0 : index
    %c0_33 = arith.constant 0 : index
    %c0_34 = arith.constant 0 : index
    %47 = vector.load %arg18[%c0_32, %c0_33, %c0_34] : memref<1x1x32xf32, #tpu.memory_space<vmem>>, vector<1x1x32xf32>
    %48 = vector.shape_cast %47 : vector<1x1x32xf32> to vector<1x32xf32>
    %49 = vector.broadcast %48 : vector<1x32xf32> to vector<11x32xf32>
    %50 = arith.addf %46, %49 : vector<11x32xf32>
    %51 = vector.extract_strided_slice %29 {offsets = [0, 0], sizes = [11, 32], strides = [1, 1]} : vector<11x64xf32> to vector<11x32xf32>
    %52 = arith.truncf %51 : vector<11x32xf32> to vector<11x32xbf16>
    %53 = vector.extract_strided_slice %39 {offsets = [0, 0], sizes = [45, 32], strides = [1, 1]} : vector<45x64xf32> to vector<45x32xf32>
    %54 = arith.truncf %53 : vector<45x32xf32> to vector<45x32xbf16>
    %cst_35 = arith.constant dense<0.000000e+00> : vector<11x45xf32>
    %55 = tpu.matmul %52, %54, %cst_35 {dimension_numbers = #tpu.dot_dimension_numbers<[1], [1], [0], [0], [0, 0, 1, 0], [], []>} : vector<11x32xbf16>, vector<45x32xbf16>, vector<11x45xf32> -> vector<11x45xf32>
    %cst_36 = arith.constant 0.176776692 : f32
    %56 = vector.broadcast %cst_36 : f32 to vector<11x45xf32>
    %57 = arith.mulf %55, %56 : vector<11x45xf32>
    %cst_37 = arith.constant 5.000000e-01 : bf16
    %58 = vector.broadcast %cst_37 : bf16 to vector<11x45xbf16>
    %59 = arith.cmpf ogt, %6, %58 : vector<11x45xbf16>
    %cst_38 = arith.constant -1.000000e+30 : f32
    %60 = vector.broadcast %cst_38 : f32 to vector<11x45xf32>
    %61 = arith.select %59, %57, %60 : vector<11x45xi1>, vector<11x45xf32>
    %cst_39 = arith.constant dense<0xFF800000> : vector<11xf32>
    %62 = vector.multi_reduction <maximumf>, %61, %cst_39 [1] : vector<11x45xf32> to vector<11xf32>
    %63 = vector.shape_cast %62 : vector<11xf32> to vector<11x1xf32>
    %64 = vector.broadcast %63 : vector<11x1xf32> to vector<11x45xf32>
    %65 = arith.subf %61, %64 : vector<11x45xf32>
    %66 = math.exp %65 : vector<11x45xf32>
    %cst_40 = arith.constant dense<0.000000e+00> : vector<11xf32>
    %67 = vector.multi_reduction <add>, %66, %cst_40 [1] : vector<11x45xf32> to vector<11xf32>
    %68 = vector.shape_cast %67 : vector<11xf32> to vector<11x1xf32>
    %69 = tpu.reciprocal %68 {approx = true} : vector<11x1xf32> -> vector<11x1xf32>
    %70 = vector.broadcast %69 : vector<11x1xf32> to vector<11x45xf32>
    %71 = arith.mulf %66, %70 : vector<11x45xf32>
    %72 = vector.extract_strided_slice %42 {offsets = [0, 0], sizes = [45, 32], strides = [1, 1]} : vector<45x64xf32> to vector<45x32xf32>
    %73 = arith.truncf %71 : vector<11x45xf32> to vector<11x45xbf16>
    %74 = arith.truncf %72 : vector<45x32xf32> to vector<45x32xbf16>
    %cst_41 = arith.constant dense<0.000000e+00> : vector<11x32xf32>
    %75 = tpu.matmul %73, %74, %cst_41 {dimension_numbers = #tpu.dot_dimension_numbers<[1], [0], [0], [1], [0, 0, 1, 1], [], []>} : vector<11x45xbf16>, vector<45x32xbf16>, vector<11x32xf32> -> vector<11x32xf32>
    %76 = vector.extract_strided_slice %44 {offsets = [0, 0], sizes = [32, 32], strides = [1, 1]} : vector<64x32xbf16> to vector<32x32xbf16>
    %77 = arith.truncf %75 : vector<11x32xf32> to vector<11x32xbf16>
    %cst_42 = arith.constant dense<0.000000e+00> : vector<11x32xf32>
    %78 = tpu.matmul %77, %76, %cst_42 {dimension_numbers = #tpu.dot_dimension_numbers<[1], [0], [0], [1], [0, 0, 1, 1], [], []>} : vector<11x32xbf16>, vector<32x32xbf16>, vector<11x32xf32> -> vector<11x32xf32>
    %79 = arith.addf %50, %78 : vector<11x32xf32>
    %80 = vector.extract_strided_slice %29 {offsets = [0, 32], sizes = [11, 32], strides = [1, 1]} : vector<11x64xf32> to vector<11x32xf32>
    %81 = arith.truncf %80 : vector<11x32xf32> to vector<11x32xbf16>
    %82 = vector.extract_strided_slice %39 {offsets = [0, 32], sizes = [45, 32], strides = [1, 1]} : vector<45x64xf32> to vector<45x32xf32>
    %83 = arith.truncf %82 : vector<45x32xf32> to vector<45x32xbf16>
    %cst_43 = arith.constant dense<0.000000e+00> : vector<11x45xf32>
    %84 = tpu.matmul %81, %83, %cst_43 {dimension_numbers = #tpu.dot_dimension_numbers<[1], [1], [0], [0], [0, 0, 1, 0], [], []>} : vector<11x32xbf16>, vector<45x32xbf16>, vector<11x45xf32> -> vector<11x45xf32>
    %cst_44 = arith.constant 0.176776692 : f32
    %85 = vector.broadcast %cst_44 : f32 to vector<11x45xf32>
    %86 = arith.mulf %84, %85 : vector<11x45xf32>
    %cst_45 = arith.constant 5.000000e-01 : bf16
    %87 = vector.broadcast %cst_45 : bf16 to vector<11x45xbf16>
    %88 = arith.cmpf ogt, %6, %87 : vector<11x45xbf16>
    %cst_46 = arith.constant -1.000000e+30 : f32
    %89 = vector.broadcast %cst_46 : f32 to vector<11x45xf32>
    %90 = arith.select %88, %86, %89 : vector<11x45xi1>, vector<11x45xf32>
    %cst_47 = arith.constant dense<0xFF800000> : vector<11xf32>
    %91 = vector.multi_reduction <maximumf>, %90, %cst_47 [1] : vector<11x45xf32> to vector<11xf32>
    %92 = vector.shape_cast %91 : vector<11xf32> to vector<11x1xf32>
    %93 = vector.broadcast %92 : vector<11x1xf32> to vector<11x45xf32>
    %94 = arith.subf %90, %93 : vector<11x45xf32>
    %95 = math.exp %94 : vector<11x45xf32>
    %cst_48 = arith.constant dense<0.000000e+00> : vector<11xf32>
    %96 = vector.multi_reduction <add>, %95, %cst_48 [1] : vector<11x45xf32> to vector<11xf32>
    %97 = vector.shape_cast %96 : vector<11xf32> to vector<11x1xf32>
    %98 = tpu.reciprocal %97 {approx = true} : vector<11x1xf32> -> vector<11x1xf32>
    %99 = vector.broadcast %98 : vector<11x1xf32> to vector<11x45xf32>
    %100 = arith.mulf %95, %99 : vector<11x45xf32>
    %101 = vector.extract_strided_slice %42 {offsets = [0, 32], sizes = [45, 32], strides = [1, 1]} : vector<45x64xf32> to vector<45x32xf32>
    %102 = arith.truncf %100 : vector<11x45xf32> to vector<11x45xbf16>
    %103 = arith.truncf %101 : vector<45x32xf32> to vector<45x32xbf16>
    %cst_49 = arith.constant dense<0.000000e+00> : vector<11x32xf32>
    %104 = tpu.matmul %102, %103, %cst_49 {dimension_numbers = #tpu.dot_dimension_numbers<[1], [0], [0], [1], [0, 0, 1, 1], [], []>} : vector<11x45xbf16>, vector<45x32xbf16>, vector<11x32xf32> -> vector<11x32xf32>
    %105 = vector.extract_strided_slice %44 {offsets = [32, 0], sizes = [32, 32], strides = [1, 1]} : vector<64x32xbf16> to vector<32x32xbf16>
    %106 = arith.truncf %104 : vector<11x32xf32> to vector<11x32xbf16>
    %cst_50 = arith.constant dense<0.000000e+00> : vector<11x32xf32>
    %107 = tpu.matmul %106, %105, %cst_50 {dimension_numbers = #tpu.dot_dimension_numbers<[1], [0], [0], [1], [0, 0, 1, 1], [], []>} : vector<11x32xbf16>, vector<32x32xbf16>, vector<11x32xf32> -> vector<11x32xf32>
    %108 = arith.addf %79, %107 : vector<11x32xf32>
    %c0_51 = arith.constant 0 : index
    %c0_52 = arith.constant 0 : index
    %109 = vector.load %arg5[%c0_51, %c0_52] : memref<2x11xf32, #tpu.memory_space<vmem>>, vector<2x11xf32>
    %c0_53 = arith.constant 0 : index
    %c0_54 = arith.constant 0 : index
    %110 = vector.load %arg6[%c0_53, %c0_54] : memref<11x2xf32, #tpu.memory_space<vmem>>, vector<11x2xf32>
    %c0_55 = arith.constant 0 : index
    %c0_56 = arith.constant 0 : index
    %111 = vector.load %arg7[%c0_55, %c0_56] : memref<2x1xf32, #tpu.memory_space<vmem>>, vector<2x1xf32>
    %112 = arith.addf %3, %108 : vector<11x32xf32>
    %cst_57 = arith.constant dense<0.000000e+00> : vector<2x32xf32>
    %113 = tpu.matmul %109, %112, %cst_57 {dimension_numbers = #tpu.dot_dimension_numbers<[1], [0], [0], [1], [0, 0, 1, 1], [], []>} : vector<2x11xf32>, vector<11x32xf32>, vector<2x32xf32> -> vector<2x32xf32>
    %cst_58 = arith.constant dense<0.000000e+00> : vector<2xf32>
    %114 = vector.multi_reduction <add>, %113, %cst_58 [1] : vector<2x32xf32> to vector<2xf32>
    %115 = vector.shape_cast %114 : vector<2xf32> to vector<2x1xf32>
    %116 = arith.divf %115, %111 : vector<2x1xf32>
    %cst_59 = arith.constant dense<0.000000e+00> : vector<11x1xf32>
    %117 = tpu.matmul %110, %116, %cst_59 {dimension_numbers = #tpu.dot_dimension_numbers<[1], [0], [0], [1], [0, 0, 1, 1], [], []>} : vector<11x2xf32>, vector<2x1xf32>, vector<11x1xf32> -> vector<11x1xf32>
    %118 = vector.broadcast %117 : vector<11x1xf32> to vector<11x32xf32>
    %119 = arith.subf %112, %118 : vector<11x32xf32>
    %120 = arith.mulf %119, %119 : vector<11x32xf32>
    %cst_60 = arith.constant dense<0.000000e+00> : vector<2x32xf32>
    %121 = tpu.matmul %109, %120, %cst_60 {dimension_numbers = #tpu.dot_dimension_numbers<[1], [0], [0], [1], [0, 0, 1, 1], [], []>} : vector<2x11xf32>, vector<11x32xf32>, vector<2x32xf32> -> vector<2x32xf32>
    %cst_61 = arith.constant dense<0.000000e+00> : vector<2xf32>
    %122 = vector.multi_reduction <add>, %121, %cst_61 [1] : vector<2x32xf32> to vector<2xf32>
    %123 = vector.shape_cast %122 : vector<2xf32> to vector<2x1xf32>
    %124 = arith.divf %123, %111 : vector<2x1xf32>
    %cst_62 = arith.constant 9.99999974E-6 : f32
    %125 = vector.broadcast %cst_62 : f32 to vector<2x1xf32>
    %126 = arith.addf %124, %125 : vector<2x1xf32>
    %127 = math.rsqrt %126 : vector<2x1xf32>
    %cst_63 = arith.constant dense<0.000000e+00> : vector<11x1xf32>
    %128 = tpu.matmul %110, %127, %cst_63 {dimension_numbers = #tpu.dot_dimension_numbers<[1], [0], [0], [1], [0, 0, 1, 1], [], []>} : vector<11x2xf32>, vector<2x1xf32>, vector<11x1xf32> -> vector<11x1xf32>
    %129 = vector.broadcast %128 : vector<11x1xf32> to vector<11x32xf32>
    %130 = arith.mulf %119, %129 : vector<11x32xf32>
    %c0_64 = arith.constant 0 : index
    %c0_65 = arith.constant 0 : index
    %c0_66 = arith.constant 0 : index
    %131 = vector.load %arg19[%c0_64, %c0_65, %c0_66] : memref<1x32x128xbf16, #tpu.memory_space<vmem>>, vector<1x32x128xbf16>
    %132 = vector.shape_cast %131 : vector<1x32x128xbf16> to vector<32x128xbf16>
    %133 = arith.truncf %130 : vector<11x32xf32> to vector<11x32xbf16>
    %cst_67 = arith.constant dense<0.000000e+00> : vector<11x128xf32>
    %134 = tpu.matmul %133, %132, %cst_67 {dimension_numbers = #tpu.dot_dimension_numbers<[1], [0], [0], [1], [0, 0, 1, 1], [], []>} : vector<11x32xbf16>, vector<32x128xbf16>, vector<11x128xf32> -> vector<11x128xf32>
    %c0_68 = arith.constant 0 : index
    %c0_69 = arith.constant 0 : index
    %c0_70 = arith.constant 0 : index
    %135 = vector.load %arg20[%c0_68, %c0_69, %c0_70] : memref<1x1x128xf32, #tpu.memory_space<vmem>>, vector<1x1x128xf32>
    %136 = vector.shape_cast %135 : vector<1x1x128xf32> to vector<1x128xf32>
    %137 = vector.broadcast %136 : vector<1x128xf32> to vector<11x128xf32>
    %138 = arith.addf %134, %137 : vector<11x128xf32>
    %cst_71 = arith.constant 0.00999999977 : f32
    %139 = vector.broadcast %cst_71 : f32 to vector<11x128xf32>
    %140 = arith.mulf %139, %138 : vector<11x128xf32>
    %141 = arith.maximumf %138, %140 : vector<11x128xf32>
    %c0_72 = arith.constant 0 : index
    %c0_73 = arith.constant 0 : index
    %c0_74 = arith.constant 0 : index
    %142 = vector.load %arg21[%c0_72, %c0_73, %c0_74] : memref<1x128x32xbf16, #tpu.memory_space<vmem>>, vector<1x128x32xbf16>
    %143 = vector.shape_cast %142 : vector<1x128x32xbf16> to vector<128x32xbf16>
    %144 = arith.truncf %141 : vector<11x128xf32> to vector<11x128xbf16>
    %cst_75 = arith.constant dense<0.000000e+00> : vector<11x32xf32>
    %145 = tpu.matmul %144, %143, %cst_75 {dimension_numbers = #tpu.dot_dimension_numbers<[1], [0], [0], [1], [0, 0, 1, 1], [], []>} : vector<11x128xbf16>, vector<128x32xbf16>, vector<11x32xf32> -> vector<11x32xf32>
    %c0_76 = arith.constant 0 : index
    %c0_77 = arith.constant 0 : index
    %c0_78 = arith.constant 0 : index
    %146 = vector.load %arg22[%c0_76, %c0_77, %c0_78] : memref<1x1x32xf32, #tpu.memory_space<vmem>>, vector<1x1x32xf32>
    %147 = vector.shape_cast %146 : vector<1x1x32xf32> to vector<1x32xf32>
    %148 = vector.broadcast %147 : vector<1x32xf32> to vector<11x32xf32>
    %149 = arith.addf %145, %148 : vector<11x32xf32>
    %150 = arith.addf %130, %149 : vector<11x32xf32>
    %cst_79 = arith.constant dense<0.000000e+00> : vector<2x32xf32>
    %151 = tpu.matmul %109, %150, %cst_79 {dimension_numbers = #tpu.dot_dimension_numbers<[1], [0], [0], [1], [0, 0, 1, 1], [], []>} : vector<2x11xf32>, vector<11x32xf32>, vector<2x32xf32> -> vector<2x32xf32>
    %cst_80 = arith.constant dense<0.000000e+00> : vector<2xf32>
    %152 = vector.multi_reduction <add>, %151, %cst_80 [1] : vector<2x32xf32> to vector<2xf32>
    %153 = vector.shape_cast %152 : vector<2xf32> to vector<2x1xf32>
    %154 = arith.divf %153, %111 : vector<2x1xf32>
    %cst_81 = arith.constant dense<0.000000e+00> : vector<11x1xf32>
    %155 = tpu.matmul %110, %154, %cst_81 {dimension_numbers = #tpu.dot_dimension_numbers<[1], [0], [0], [1], [0, 0, 1, 1], [], []>} : vector<11x2xf32>, vector<2x1xf32>, vector<11x1xf32> -> vector<11x1xf32>
    %156 = vector.broadcast %155 : vector<11x1xf32> to vector<11x32xf32>
    %157 = arith.subf %150, %156 : vector<11x32xf32>
    %158 = arith.mulf %157, %157 : vector<11x32xf32>
    %cst_82 = arith.constant dense<0.000000e+00> : vector<2x32xf32>
    %159 = tpu.matmul %109, %158, %cst_82 {dimension_numbers = #tpu.dot_dimension_numbers<[1], [0], [0], [1], [0, 0, 1, 1], [], []>} : vector<2x11xf32>, vector<11x32xf32>, vector<2x32xf32> -> vector<2x32xf32>
    %cst_83 = arith.constant dense<0.000000e+00> : vector<2xf32>
    %160 = vector.multi_reduction <add>, %159, %cst_83 [1] : vector<2x32xf32> to vector<2xf32>
    %161 = vector.shape_cast %160 : vector<2xf32> to vector<2x1xf32>
    %162 = arith.divf %161, %111 : vector<2x1xf32>
    %cst_84 = arith.constant 9.99999974E-6 : f32
    %163 = vector.broadcast %cst_84 : f32 to vector<2x1xf32>
    %164 = arith.addf %162, %163 : vector<2x1xf32>
    %165 = math.rsqrt %164 : vector<2x1xf32>
    %cst_85 = arith.constant dense<0.000000e+00> : vector<11x1xf32>
    %166 = tpu.matmul %110, %165, %cst_85 {dimension_numbers = #tpu.dot_dimension_numbers<[1], [0], [0], [1], [0, 0, 1, 1], [], []>} : vector<11x2xf32>, vector<2x1xf32>, vector<11x1xf32> -> vector<11x1xf32>
    %167 = vector.broadcast %166 : vector<11x1xf32> to vector<11x32xf32>
    %168 = arith.mulf %157, %167 : vector<11x32xf32>
    %c0_86 = arith.constant 0 : index
    %c0_87 = arith.constant 0 : index
    %169 = vector.load %arg25[%c0_86, %c0_87] : memref<11x32xf32, #tpu.memory_space<vmem>>, vector<11x32xf32>
    tpu.vector_store %arg25[%c0_86, %c0_87], %168 {strides = array<i32>} : memref<11x32xf32, #tpu.memory_space<vmem>>, vector<11x32xf32>,
    %c2_i32 = arith.constant 2 : i32
    %170 = arith.cmpi eq, %arg0, %c2_i32 : i32
    %171 = arith.extui %170 : i1 to i32
    %c0_i32_88 = arith.constant 0 : i32
    %172 = arith.cmpi ne, %171, %c0_i32_88 : i32
    scf.if %172 {
      %c0_89 = arith.constant 0 : index
      %c0_90 = arith.constant 0 : index
      %173 = vector.load %arg12[%c0_89, %c0_90] : memref<2x32xf32, #tpu.memory_space<vmem>>, vector<2x32xf32>
      %c0_91 = arith.constant 0 : index
      %c0_92 = arith.constant 0 : index
      %174 = vector.load %arg8[%c0_91, %c0_92] : memref<2x11xbf16, #tpu.memory_space<vmem>>, vector<2x11xbf16>
      %175 = arith.truncf %168 : vector<11x32xf32> to vector<11x32xbf16>
      %cst_93 = arith.constant dense<0.000000e+00> : vector<2x32xf32>
      %176 = tpu.matmul %174, %175, %cst_93 {dimension_numbers = #tpu.dot_dimension_numbers<[1], [0], [0], [1], [0, 0, 1, 1], [], []>} : vector<2x11xbf16>, vector<11x32xbf16>, vector<2x32xf32> -> vector<2x32xf32>
      %c0_94 = arith.constant 0 : index
      %c0_95 = arith.constant 0 : index
      %177 = vector.load %arg10[%c0_94, %c0_95] : memref<2x1xf32, #tpu.memory_space<vmem>>, vector<2x1xf32>
      %178 = vector.broadcast %177 : vector<2x1xf32> to vector<2x32xf32>
      %179 = arith.divf %176, %178 : vector<2x32xf32>
      %c0_96 = arith.constant 0 : index
      %c0_97 = arith.constant 0 : index
      %180 = vector.load %arg11[%c0_96, %c0_97] : memref<2x11xf32, #tpu.memory_space<vmem>>, vector<2x11xf32>
      %cst_98 = arith.constant dense<0.000000e+00> : vector<2x32xf32>
      %181 = tpu.matmul %180, %168, %cst_98 {dimension_numbers = #tpu.dot_dimension_numbers<[1], [0], [0], [1], [0, 0, 1, 1], [], []>} : vector<2x11xf32>, vector<11x32xf32>, vector<2x32xf32> -> vector<2x32xf32>
      %182 = tpu.concatenate %179, %181, %173 in 1 : vector<2x32xf32>, vector<2x32xf32>, vector<2x32xf32> -> vector<2x96xf32>
      %c0_99 = arith.constant 0 : index
      %c0_100 = arith.constant 0 : index
      %183 = vector.load %arg24[%c0_99, %c0_100] : memref<2x96xf32, #tpu.memory_space<vmem>>, vector<2x96xf32>
      tpu.vector_store %arg24[%c0_99, %c0_100], %182 {strides = array<i32>} : memref<2x96xf32, #tpu.memory_space<vmem>>, vector<2x96xf32>,
      %c0_101 = arith.constant 0 : index
      %c0_102 = arith.constant 0 : index
      %184 = vector.load %arg9[%c0_101, %c0_102] : memref<9x2xf32, #tpu.memory_space<vmem>>, vector<9x2xf32>
      %cst_103 = arith.constant dense<0.000000e+00> : vector<9x32xf32>
      %185 = tpu.matmul %184, %173, %cst_103 {dimension_numbers = #tpu.dot_dimension_numbers<[1], [0], [0], [1], [0, 0, 1, 1], [], []>} : vector<9x2xf32>, vector<2x32xf32>, vector<9x32xf32> -> vector<9x32xf32>
      %186 = vector.extract_strided_slice %168 {offsets = [0, 0], sizes = [9, 32], strides = [1, 1]} : vector<11x32xf32> to vector<9x32xf32>
      %187 = tpu.concatenate %186, %185 in 1 : vector<9x32xf32>, vector<9x32xf32> -> vector<9x64xf32>
      %c0_104 = arith.constant 0 : index
      %c0_105 = arith.constant 0 : index
      %188 = vector.load %arg23[%c0_104, %c0_105] : memref<9x64xf32, #tpu.memory_space<vmem>>, vector<9x64xf32>
      tpu.vector_store %arg23[%c0_104, %c0_105], %187 {strides = array<i32>} : memref<9x64xf32, #tpu.memory_space<vmem>>, vector<9x64xf32>,
    } else {
    }
    return
  }
  func.func @transform_0(%arg0: i32) -> (i32, i32) {
    %c0_i32 = arith.constant 0 : i32
    %c0_i32_0 = arith.constant 0 : i32
    %c0_i32_1 = arith.constant 0 : i32
    return %c0_i32, %c0_i32_0 : i32, i32
  }
  func.func @transform_1(%arg0: i32) -> (i32, i32) {
    %c0_i32 = arith.constant 0 : i32
    %c0_i32_0 = arith.constant 0 : i32
    %c0_i32_1 = arith.constant 0 : i32
    return %c0_i32, %c0_i32_0 : i32, i32
  }
  func.func @transform_2(%arg0: i32) -> (i32, i32) {
    %c0_i32 = arith.constant 0 : i32
    %c0_i32_0 = arith.constant 0 : i32
    %c0_i32_1 = arith.constant 0 : i32
    return %c0_i32, %c0_i32_0 : i32, i32
  }
  func.func @transform_3(%arg0: i32) -> (i32, i32) {
    %c0_i32 = arith.constant 0 : i32
    %c0_i32_0 = arith.constant 0 : i32
    %c0_i32_1 = arith.constant 0 : i32
    return %c0_i32, %c0_i32_0 : i32, i32
  }
  func.func @transform_4(%arg0: i32) -> (i32, i32) {
    %c0_i32 = arith.constant 0 : i32
    %c0_i32_0 = arith.constant 0 : i32
    %c0_i32_1 = arith.constant 0 : i32
    return %c0_i32, %c0_i32_0 : i32, i32
  }
  func.func @transform_5(%arg0: i32) -> (i32, i32) {
    %c0_i32 = arith.constant 0 : i32
    %c0_i32_0 = arith.constant 0 : i32
    %c0_i32_1 = arith.constant 0 : i32
    return %c0_i32, %c0_i32_0 : i32, i32
  }
  func.func @transform_6(%arg0: i32) -> (i32, i32) {
    %c0_i32 = arith.constant 0 : i32
    %c0_i32_0 = arith.constant 0 : i32
    %c0_i32_1 = arith.constant 0 : i32
    return %c0_i32, %c0_i32_0 : i32, i32
  }
  func.func @transform_7(%arg0: i32) -> (i32, i32) {
    %c0_i32 = arith.constant 0 : i32
    %c0_i32_0 = arith.constant 0 : i32
    %c0_i32_1 = arith.constant 0 : i32
    return %c0_i32, %c0_i32_0 : i32, i32
  }
  func.func @transform_8(%arg0: i32) -> (i32, i32) {
    %c0_i32 = arith.constant 0 : i32
    %c0_i32_0 = arith.constant 0 : i32
    %c0_i32_1 = arith.constant 0 : i32
    return %c0_i32, %c0_i32_0 : i32, i32
  }
  func.func @transform_9(%arg0: i32) -> (i32, i32) {
    %c0_i32 = arith.constant 0 : i32
    %c0_i32_0 = arith.constant 0 : i32
    %c0_i32_1 = arith.constant 0 : i32
    return %c0_i32, %c0_i32_0 : i32, i32
  }
  func.func @transform_10(%arg0: i32) -> (i32, i32) {
    %c0_i32 = arith.constant 0 : i32
    %c0_i32_0 = arith.constant 0 : i32
    %c0_i32_1 = arith.constant 0 : i32
    return %c0_i32, %c0_i32_0 : i32, i32
  }
  func.func @transform_11(%arg0: i32) -> (i32, i32) {
    %c0_i32 = arith.constant 0 : i32
    %c0_i32_0 = arith.constant 0 : i32
    %c0_i32_1 = arith.constant 0 : i32
    return %c0_i32, %c0_i32_0 : i32, i32
  }
  func.func @transform_12(%arg0: i32) -> (i32, i32, i32) {
    %c0_i32 = arith.constant 0 : i32
    %c0_i32_0 = arith.constant 0 : i32
    %c0_i32_1 = arith.constant 0 : i32
    return %arg0, %c0_i32, %c0_i32_0 : i32, i32, i32
  }
  func.func @transform_13(%arg0: i32) -> (i32, i32, i32) {
    %c0_i32 = arith.constant 0 : i32
    %c0_i32_0 = arith.constant 0 : i32
    %c0_i32_1 = arith.constant 0 : i32
    return %arg0, %c0_i32, %c0_i32_0 : i32, i32, i32
  }
  func.func @transform_14(%arg0: i32) -> (i32, i32, i32) {
    %c0_i32 = arith.constant 0 : i32
    %c0_i32_0 = arith.constant 0 : i32
    %c0_i32_1 = arith.constant 0 : i32
    return %arg0, %c0_i32, %c0_i32_0 : i32, i32, i32
  }
  func.func @transform_15(%arg0: i32) -> (i32, i32, i32) {
    %c0_i32 = arith.constant 0 : i32
    %c0_i32_0 = arith.constant 0 : i32
    %c0_i32_1 = arith.constant 0 : i32
    return %arg0, %c0_i32, %c0_i32_0 : i32, i32, i32
  }
  func.func @transform_16(%arg0: i32) -> (i32, i32, i32) {
    %c0_i32 = arith.constant 0 : i32
    %c0_i32_0 = arith.constant 0 : i32
    %c0_i32_1 = arith.constant 0 : i32
    return %arg0, %c0_i32, %c0_i32_0 : i32, i32, i32
  }
  func.func @transform_17(%arg0: i32) -> (i32, i32, i32) {
    %c0_i32 = arith.constant 0 : i32
    %c0_i32_0 = arith.constant 0 : i32
    %c0_i32_1 = arith.constant 0 : i32
    return %arg0, %c0_i32, %c0_i32_0 : i32, i32, i32
  }
  func.func @transform_18(%arg0: i32) -> (i32, i32, i32) {
    %c0_i32 = arith.constant 0 : i32
    %c0_i32_0 = arith.constant 0 : i32
    %c0_i32_1 = arith.constant 0 : i32
    return %arg0, %c0_i32, %c0_i32_0 : i32, i32, i32
  }
  func.func @transform_19(%arg0: i32) -> (i32, i32, i32) {
    %c0_i32 = arith.constant 0 : i32
    %c0_i32_0 = arith.constant 0 : i32
    %c0_i32_1 = arith.constant 0 : i32
    return %arg0, %c0_i32, %c0_i32_0 : i32, i32, i32
  }
  func.func @transform_20(%arg0: i32) -> (i32, i32, i32) {
    %c0_i32 = arith.constant 0 : i32
    %c0_i32_0 = arith.constant 0 : i32
    %c0_i32_1 = arith.constant 0 : i32
    return %arg0, %c0_i32, %c0_i32_0 : i32, i32, i32
  }
  func.func @transform_21(%arg0: i32) -> (i32, i32, i32) {
    %c0_i32 = arith.constant 0 : i32
    %c0_i32_0 = arith.constant 0 : i32
    %c0_i32_1 = arith.constant 0 : i32
    return %arg0, %c0_i32, %c0_i32_0 : i32, i32, i32
  }
  func.func @transform_22(%arg0: i32) -> (i32, i32) {
    %c0_i32 = arith.constant 0 : i32
    %c0_i32_0 = arith.constant 0 : i32
    %c0_i32_1 = arith.constant 0 : i32
    return %c0_i32, %c0_i32_0 : i32, i32
  }
  func.func @transform_23(%arg0: i32) -> (i32, i32) {
    %c0_i32 = arith.constant 0 : i32
    %c0_i32_0 = arith.constant 0 : i32
    %c0_i32_1 = arith.constant 0 : i32
    return %c0_i32, %c0_i32_0 : i32, i32
  }
}

</mosaic_0001>

<bundles_post_ra>
// kernel: graph_transformer_forward.2
= control target key start
LH: loop header
LB: loop body
LE: loop exit
PB: predicated region body
PF: predicated region fallthrough
CT: control target
= control target key end

     0   :  { %vm87_vm0 = vcmask 1043456   ;;  %v830_v0 = vmov 0.0   ;;  %vm831_vm1 = vmmov 0   ;;  %vm83_vm2 = vcmask 64512   ;;  %s1096_s3 = inlined_call_operand.vmem [shape: bf16[8,32], index: 3, kind: input, shape index: {}]   ;;  %s1097_s0 = inlined_call_operand.vmem [shape: f32[9,8], index: 0, kind: input, shape index: {}]   ;;  %s1098_s5 = inlined_call_operand.vmem [shape: bf16[32,32], index: 5, kind: input, shape index: {}]   ;;  %s1099_s4 = inlined_call_operand.vmem [shape: f32[1,32], index: 4, kind: input, shape index: {}]   ;;  %s1100_s9 = inlined_call_operand.vmem [shape: bf16[4,32], index: 9, kind: input, shape index: {}]   ;;  %s1101_s1 = inlined_call_operand.vmem [shape: f32[16,4], index: 1, kind: input, shape index: {}]   ;;  %s1102_s7 = inlined_call_operand.vmem [shape: bf16[32,32], index: 7, kind: input, shape index: {}]   ;;  %s1103_s11 = inlined_call_operand.vmem [shape: bf16[32,32], index: 11, kind: input, shape index: {}]   ;;  %s1104_s6 = inlined_call_operand.vmem [shape: f32[1,32], index: 6, kind: input, shape index: {}]   ;;  %s1105_s10 = inlined_call_operand.vmem [shape: f32[1,32], index: 10, kind: input, shape index: {}]   ;;  %s1106_s15 = inlined_call_operand.vmem [shape: bf16[6,32], index: 15, kind: input, shape index: {}]   ;;  %s1107_s2 = inlined_call_operand.vmem [shape: f32[2,6], index: 2, kind: input, shape index: {}]   ;;  %s1108_s13 = inlined_call_operand.vmem [shape: bf16[32,32], index: 13, kind: input, shape index: {}]   ;;  %s1109_s17 = inlined_call_operand.vmem [shape: bf16[32,32], index: 17, kind: input, shape index: {}]   ;;  %s1110_s8 = inlined_call_operand.vmem [shape: f32[1,32], index: 8, kind: input, shape index: {}]   ;;  %s1111_s21 = inlined_call_operand.vmem [shape: f32[9,32], index: 21, kind: output, shape index: {0}]   ;;  %s1112_s12 = inlined_call_operand.vmem [shape: f32[1,32], index: 12, kind: input, shape index: {}]   ;;  %s1113_s16 = inlined_call_operand.vmem [shape: f32[1,32], index: 16, kind: input, shape index: {}]   ;;  %s1114_s19 = inlined_call_operand.vmem [shape: bf16[32,32], index: 19, kind: input, shape index: {}]   ;;  %s1115_s14 = inlined_call_operand.vmem [shape: f32[1,32], index: 14, kind: input, shape index: {}]   ;;  %s1116_s22 = inlined_call_operand.vmem [shape: f32[16,32], index: 22, kind: output, shape index: {1}]   ;;  %s1117_s18 = inlined_call_operand.vmem [shape: f32[1,32], index: 18, kind: input, shape index: {}]   ;;  %s1118_s20 = inlined_call_operand.vmem [shape: f32[1,32], index: 20, kind: input, shape index: {}]   ;;  %s1119_s23 = inlined_call_operand.vmem [shape: f32[2,32], index: 23, kind: output, shape index: {2}]  }
   0x1   :  { %1125 = sst [smem:[#allocation2_spill]] %s1096_s3  ;;  %750 = vmatprep.subr.bf16.mxu0 %v830_v0  ;;  %752 = vmatprep.mubr.msk.bf16.mxu0 %vm831_vm1, %v830_v0  ;;  %vm295_vm3 = vcmask 1041408   ;;  %vm160_vm4 = vcmask 261120   ;;  %vm291_vm5 = vcmask 31744   ;;  %v698_v27 = vld [vmem:[%s1104_s6] ss:$0 sm:$0xff] }
   0x2   :  { %1126 = sst [smem:[#allocation3_spill]] %s1097_s0  ;;  %s1133_s24 = sld [smem:[#allocation2_spill]]  ;;  %756 = vmatprep.subr.bf16.mxu1 %v830_v0  ;;  %760 = vmatprep.mubr.msk.bf16.mxu1 %vm831_vm1, %v830_v0  ;;  %v706_v36 = vld [vmem:[%s1105_s10] ss:$0 sm:$0xff]  ;;  %vm500_vm6 = vcmask 1042432   ;;  %vm496_vm7 = vcmask 48128  }
   0x3   :  { %1127 = sst [smem:[#allocation4_spill]] %s1098_s5  ;;  %s1134_s0 = sld [smem:[#allocation3_spill]]  ;;  %v487_v50 = vld [vmem:[%s1106_s15] sm:$0x7]  ;;  %v825_v58 = vld [vmem:[%s1108_s13 + $0x8] sm:$0xff]   ;;  %vm278_vm8 = vcmask 253952  }
   0x4   :  { %1128 = sst [smem:[#allocation5_spill]] %s1099_s4  ;;  %v502_v54 = vsel %vm500_vm6, %v487_v50, 0  ;;  %v486_v55 = vld [vmem:[%s1107_s2] sm:$0x3]  ;;  %vm682_vm9 = vcmask 254976  }
   0x5   :  { %1129 = sst [smem:[#allocation6_spill]] %s1100_s9  ;;  %s1136_s9 = sld [smem:[#allocation5_spill]]  ;;  %v488_v56 = vpack.c.bf16 %v486_v55, %v486_v55  ;;  %v824_v57 = vld [vmem:[%s1108_s13] sm:$0xff]  }
   0x6   :  { %1130 = sst [smem:[#allocation7_spill]] %s1101_s1  ;;  %s1137_s25 = sld [smem:[#allocation6_spill]]  ;;  %v702_v59 = vld [vmem:[%s1110_s8] ss:$0 sm:$0xff] }
   0x7   :  { %1131 = sst [smem:[#allocation8_spill]] %s1102_s7  ;;  %s1138_s26 = sld [smem:[#allocation7_spill]] }
   0x8   :  { %1132 = sst [smem:[#allocation9_spill]] %s1103_s11  ;;  %v74_v1 = vld [vmem:[%s1133_s24] sm:$0xf]  ;;  %s1135_s11 = sld [smem:[#allocation4_spill]] }
   0x9   :  { %v72_v2 = vld [vmem:[%s1134_s0] sm:$0xff]  ;;  %v73_v3 = vld [vmem:[%s1134_s0 + $0x8] sm:$0x1]  ;;  %v89_v4 = vsel %vm87_vm0, %v74_v1, 0  ;;  %s1139_s28 = sld [smem:[#allocation8_spill]]  ;;  %s1140_s0 = sld [smem:[#allocation9_spill]] }
   0xa   :  { %v75_v5 = vpack.c.bf16 %v73_v3, %v72_v2  ;;  %751 = vmatpush3.bf16.msra.mxu0 %v89_v4  ;;  %v708_v3 = vld [vmem:[%s1112_s12] ss:$0 sm:$0xff] }
   0xb   :  { %764 = vmatprep.subr.bf16.mxu0 %v830_v0  ;;  %v696_v8 = vld [vmem:[%s1136_s9] ss:$0 sm:$0xff] }
   0xc   :  { %v282_v17 = vld [vmem:[%s1137_s25] sm:$0x3] }
   0xd   :  { %753 = vmatmul.mubr.msk.bf16.vlgmr.msra.gmra.mrb[0].mxu0 %vm83_vm2, %v75_v5  ;;  %v297_v21 = vsel %vm295_vm3, %v282_v17, 0  ;;  %v280_v22 = vld [vmem:[%s1138_s26] sm:$0xff]  ;;  %v281_v23 = vld [vmem:[%s1138_s26 + $0x8] sm:$0xff] }
   0xe   :  { %768 = vmatprep.mubr.msk.bf16.mxu0 %vm831_vm1, %v830_v0  ;;  %v818_v6 = vld [vmem:[%s1135_s11] sm:$0xff]   ;;  %v819_v7 = vld [vmem:[%s1135_s11 + $0x8] sm:$0xff]   ;;  %v283_v24 = vpack.c.bf16 %v281_v23, %v280_v22 }
   0xf   :  { %757 = vmatpush3.bf16.msra.mxu1 %v818_v6  ;;  %v820_v25 = vld [vmem:[%s1139_s28] sm:$0xff]   ;;  %v821_v26 = vld [vmem:[%s1139_s28 + $0x8] sm:$0xff]  }
  0x10   :  { %758 = vmatprep.subr.bf16.mxu1 %v830_v0  ;;  %765 = vmatpush3.bf16.msra.mxu0 %v820_v25  ;;  %v822_v40 = vld [vmem:[%s1140_s0] sm:$0xff]   ;;  %v823_v48 = vld [vmem:[%s1140_s0 + $0x8] sm:$0xff]  }
  0x11   :  { %766 = vmatprep.subr.bf16.mxu0 %v830_v0  ;;  %v827_v23 = vld [vmem:[%s1109_s17 + $0x8] sm:$0xff]  }
  0x13   :  { %759 = vmatpush3.bf16.msra.mxu1 %v819_v7 }
  0x14   :  { %772 = vmatprep.subr.bf16.mxu1 %v830_v0  ;;  %767 = vmatpush3.bf16.msra.mxu0 %v821_v26  ;;  %v828_v26 = vld [vmem:[%s1114_s19] sm:$0xff]  }
  0x15   :  { %778 = vmatprep.subr.bf16.mxu0 %v830_v0 }
  0xe0   :  { %v125_v9 = vpop.f32.mrb[0].mxu0 }
  0xe1   :  { %v126_v10 = vadd.f32 %v696_v8, %v125_v9  ;;  %v754_v11 = vpop.f32.mrb[1].mxu0 }
  0xe2   :  { %v128_v12 = vpop.f32.mrb[2].mxu0 }
  0xe3   :  { %v132_v13 = vmul.f32 0.01, %v126_v10  ;;  %v129_v14 = vadd.f32 %v696_v8, %v128_v12  ;;  %v755_v15 = vpop.f32.mrb[3].mxu0  ;;  %v716_v12 = vld [vmem:[%s1113_s16] ss:$0 sm:$0xff] }
  0xe5   :  { %v133_v16 = vmul.f32 0.01, %v129_v14  ;;  %v134_v18 = vmax.f32 %v126_v10, %v132_v13 }
  0xe7   :  { %v135_v19 = vmax.f32 %v129_v14, %v133_v16  ;;  %v826_v16 = vld [vmem:[%s1109_s17] sm:$0xff]  }
  0xe9   :  { %v140_v20 = vpack.c.bf16 %v135_v19, %v134_v18 }
  0xeb   :  { %761 = vmatmul.mubr.msk.bf16.vlgmr.msra.gmra.mrb[0].mxu1 %vm160_vm4, %v140_v20 }
  0xec   :  { %773 = vmatpush3.bf16.msra.mxu1 %v297_v21  ;;  %774 = vmatprep.mubr.msk.bf16.mxu1 %vm831_vm1, %v830_v0 }
  0xed   :  { %786 = vmatprep.subr.bf16.mxu1 %v830_v0 }
  0xf3   :  { %775 = vmatmul.mubr.msk.bf16.vlgmr.msra.gmra.mrb[4].mxu1 %vm291_vm5, %v283_v24 }
  0xf4   :  { %790 = vmatprep.mubr.msk.bf16.mxu1 %vm831_vm1, %v830_v0  ;;  %787 = vmatpush3.bf16.msra.mxu1 %v824_v57 }
  0xf5   :  { %788 = vmatprep.subr.bf16.mxu1 %v830_v0 }
  0xf8   :  { %789 = vmatpush3.bf16.msra.mxu1 %v825_v58 }
  0xf9   :  { %800 = vmatprep.subr.bf16.mxu1 %v830_v0 }
 0x1be   :  { %v198_v28 = vpop.f32.mrb[0].mxu1 }
 0x1bf   :  { %v199_v29 = vadd.f32 %v698_v27, %v198_v28  ;;  %v762_v30 = vpop.f32.mrb[1].mxu1  ;;  %v712_v28 = vld [vmem:[%s1115_s14] ss:$0 sm:$0xff] }
 0x1c0   :  { %v201_v31 = vpop.f32.mrb[2].mxu1 }
 0x1c1   :  { %v205_v32 = vmul.f32 0.01, %v199_v29  ;;  %v202_v33 = vadd.f32 %v698_v27, %v201_v31  ;;  %v763_v34 = vpop.f32.mrb[3].mxu1  ;;  %v829_v27 = vld [vmem:[%s1114_s19 + $0x8] sm:$0xff]  }
 0x1c2   :  { %v718_v34 = vld [vmem:[%s1117_s18] ss:$0 sm:$0xff] }
 0x1c3   :  { %v206_v35 = vmul.f32 0.01, %v202_v33  ;;  %v207_v37 = vmax.f32 %v199_v29, %v205_v32 }
 0x1c5   :  { %v208_v38 = vmax.f32 %v202_v33, %v206_v35 }
 0x1c6   :  { %v333_v39 = vpop.f32.mrb[4].mxu1 }
 0x1c7   :  { %v213_v41 = vpack.c.bf16 %v208_v38, %v207_v37  ;;  %v334_v42 = vadd.f32 %v706_v36, %v333_v39  ;;  %v776_v43 = vpop.f32.mrb[5].mxu1 }
 0x1c8   :  { %v336_v44 = vpop.f32.mrb[6].mxu1  ;;  %v722_v43 = vld [vmem:[%s1118_s20] ss:$0 sm:$0xff] }
 0x1c9   :  { %v340_v45 = vmul.f32 0.01, %v334_v42  ;;  %v337_v46 = vadd.f32 %v706_v36, %v336_v44  ;;  %769 = vmatmul.mubr.msk.bf16.vlgmr.msra.gmra.mrb[4].mxu0 %vm160_vm4, %v213_v41  ;;  %v777_v47 = vpop.f32.mrb[7].mxu1 }
 0x1ca   :  { %779 = vmatpush3.bf16.msra.mxu0 %v822_v40  ;;  %782 = vmatprep.mubr.msk.bf16.mxu0 %vm831_vm1, %v830_v0 }
 0x1cb   :  { %v341_v49 = vmul.f32 0.01, %v337_v46  ;;  %780 = vmatprep.subr.bf16.mxu0 %v830_v0  ;;  %v342_v51 = vmax.f32 %v334_v42, %v340_v45 }
 0x1cd   :  { %v343_v52 = vmax.f32 %v337_v46, %v341_v49 }
 0x1ce   :  { %781 = vmatpush3.bf16.msra.mxu0 %v823_v48 }
 0x1cf   :  { %v348_v53 = vpack.c.bf16 %v343_v52, %v342_v51  ;;  %794 = vmatprep.subr.bf16.mxu0 %v830_v0 }
 0x1d1   :  { %783 = vmatmul.mubr.msk.bf16.vlgmr.msra.gmra.mrb[8].mxu0 %vm160_vm4, %v348_v53 }
 0x1d2   :  { %795 = vmatpush3.bf16.msra.mxu0 %v502_v54  ;;  %796 = vmatprep.mubr.msk.bf16.mxu0 %vm831_vm1, %v830_v0 }
 0x1d3   :  { %808 = vmatprep.subr.bf16.mxu0 %v830_v0 }
 0x1d9   :  { %797 = vmatmul.mubr.msk.bf16.vlgmr.msra.gmra.mrb[12].mxu0 %vm496_vm7, %v488_v56 }
 0x1da   :  { %812 = vmatprep.mubr.msk.bf16.mxu0 %vm831_vm1, %v830_v0  ;;  %809 = vmatpush3.bf16.msra.mxu0 %v828_v26 }
 0x1db   :  { %810 = vmatprep.subr.bf16.mxu0 %v830_v0 }
 0x1de   :  { %811 = vmatpush3.bf16.msra.mxu0 %v829_v27 }
 0x29c   :  { %v270_v60 = vpop.f32.mrb[4].mxu0 }
 0x29d   :  { %v271_v61 = vadd.f32 %v702_v59, %v270_v60  ;;  %v770_v62 = vpop.f32.mrb[5].mxu0 }
 0x29e   :  { %v273_v63 = vpop.f32.mrb[6].mxu0 }
 0x29f   :  { %277 = vst.msk [vmem:[%s1111_s21] sm:$0xff] %vm160_vm4, %v271_v61  ;;  %v274_v1 = vadd.f32 %v702_v59, %v273_v63  ;;  %v771_v2 = vpop.f32.mrb[7].mxu0 }
 0x2a1   :  { %279 = vst.msk [vmem:[%s1111_s21 + $0x8] sm:$0x1] %vm278_vm8, %v274_v1 }
 0x2a4   :  { %v405_v4 = vpop.f32.mrb[8].mxu0 }
 0x2a5   :  { %v406_v5 = vadd.f32 %v708_v3, %v405_v4  ;;  %v784_v6 = vpop.f32.mrb[9].mxu0 }
 0x2a6   :  { %v408_v7 = vpop.f32.mrb[10].mxu0 }
 0x2a7   :  { %v412_v8 = vmul.f32 0.01, %v406_v5  ;;  %v409_v9 = vadd.f32 %v708_v3, %v408_v7  ;;  %v785_v10 = vpop.f32.mrb[11].mxu0 }
 0x2a9   :  { %v413_v11 = vmul.f32 0.01, %v409_v9  ;;  %v414_v13 = vmax.f32 %v406_v5, %v412_v8 }
 0x2ab   :  { %v415_v14 = vmax.f32 %v409_v9, %v413_v11 }
 0x2ac   :  { %v538_v15 = vpop.f32.mrb[12].mxu0 }
 0x2ad   :  { %v420_v17 = vpack.c.bf16 %v415_v14, %v414_v13  ;;  %v539_v18 = vadd.f32 %v716_v12, %v538_v15  ;;  %v798_v19 = vpop.f32.mrb[13].mxu0 }
 0x2ae   :  { %v541_v20 = vpop.f32.mrb[14].mxu0 }
 0x2af   :  { %v544_v21 = vmul.f32 0.01, %v539_v18  ;;  %791 = vmatmul.mubr.msk.bf16.vlgmr.msra.gmra.mrb[8].mxu1 %vm160_vm4, %v420_v17  ;;  %v799_v22 = vpop.f32.mrb[15].mxu0 }
 0x2b0   :  { %801 = vmatpush3.bf16.msra.mxu1 %v826_v16  ;;  %804 = vmatprep.mubr.msk.bf16.mxu1 %vm831_vm1, %v830_v0 }
 0x2b1   :  { %v545_v24 = vmax.f32 %v539_v18, %v544_v21  ;;  %802 = vmatprep.subr.bf16.mxu1 %v830_v0 }
 0x2b3   :  { %v550_v25 = vpack.c.bf16 %v545_v24, %v545_v24 }
 0x2b4   :  { %803 = vmatpush3.bf16.msra.mxu1 %v827_v23 }
 0x2b7   :  { %805 = vmatmul.mubr.msk.bf16.vlgmr.msra.gmra.mrb[12].mxu1 %vm160_vm4, %v550_v25 }
 0x382   :  { %v477_v29 = vpop.f32.mrb[8].mxu1 }
 0x383   :  { %v478_v30 = vadd.f32 %v712_v28, %v477_v29  ;;  %v792_v31 = vpop.f32.mrb[9].mxu1 }
 0x384   :  { %v480_v32 = vpop.f32.mrb[10].mxu1 }
 0x385   :  { %484 = vst.msk [vmem:[%s1116_s22] sm:$0xff] %vm160_vm4, %v478_v30  ;;  %v481_v33 = vadd.f32 %v712_v28, %v480_v32  ;;  %v793_v0 = vpop.f32.mrb[11].mxu1 }
 0x387   :  { %485 = vst.msk [vmem:[%s1116_s22 + $0x8] sm:$0xff] %vm160_vm4, %v481_v33 }
 0x38a   :  { %v607_v35 = vpop.f32.mrb[12].mxu1 }
 0x38b   :  { %v608_v36 = vadd.f32 %v718_v34, %v607_v35  ;;  %v806_v37 = vpop.f32.mrb[13].mxu1 }
 0x38c   :  { %v610_v38 = vpop.f32.mrb[14].mxu1 }
 0x38d   :  { %v613_v39 = vmul.f32 0.01, %v608_v36  ;;  %v807_v40 = vpop.f32.mrb[15].mxu1 }
 0x38f   :  { %v614_v41 = vmax.f32 %v608_v36, %v613_v39 }
 0x391   :  { %v619_v42 = vpack.c.bf16 %v614_v41, %v614_v41 }
 0x393   :  { %813 = vmatmul.mubr.msk.bf16.vlgmr.msra.gmra.mrb[16].mxu0 %vm160_vm4, %v619_v42 }
 0x466   :  { %v676_v44 = vpop.f32.mrb[16].mxu0 }
 0x467   :  { %v677_v45 = vadd.f32 %v722_v43, %v676_v44  ;;  %v814_v46 = vpop.f32.mrb[17].mxu0 }
 0x468   :  { %v679_v47 = vpop.f32.mrb[18].mxu0 }
 0x469   :  { %683 = vst.msk [vmem:[%s1119_s23] sm:$0x3] %vm682_vm9, %v677_v45  ;;  %v815_v48 = vpop.f32.mrb[19].mxu0 }

// kernel: graph_transformer_forward.3
= control target key start
LH: loop header
LB: loop body
LE: loop exit
PB: predicated region body
PF: predicated region fallthrough
CT: control target
= control target key end

     0   :  { %s4515_s0 = inlined_call_operand.vmem [shape: f32[11,32], index: 0, kind: input, shape index: {}]   ;;  %s4516_s1 = inlined_call_operand.vmem [shape: f32[45,32], index: 1, kind: input, shape index: {}]   ;;  %s4517_s2 = inlined_call_operand.vmem [shape: bf16[45,11], index: 2, kind: input, shape index: {}]   ;;  %s4518_s3 = inlined_call_operand.vmem [shape: bf16[11,45], index: 3, kind: input, shape index: {}]   ;;  %s4519_s4 = inlined_call_operand.vmem [shape: f32[2,11], index: 4, kind: input, shape index: {}]   ;;  %s4520_s5 = inlined_call_operand.vmem [shape: f32[11,2], index: 5, kind: input, shape index: {}]   ;;  %s4521_s6 = inlined_call_operand.vmem [shape: f32[2,1], index: 6, kind: input, shape index: {}]   ;;  %s4522_s7 = inlined_call_operand.vmem [shape: bf16[2,11], index: 7, kind: input, shape index: {}]   ;;  %s4523_s8 = inlined_call_operand.vmem [shape: f32[9,2], index: 8, kind: input, shape index: {}]   ;;  %s4524_s9 = inlined_call_operand.vmem [shape: f32[2,1], index: 9, kind: input, shape index: {}]   ;;  %s4525_s10 = inlined_call_operand.vmem [shape: f32[2,11], index: 10, kind: input, shape index: {}]   ;;  %s4526_s11 = inlined_call_operand.vmem [shape: f32[2,32], index: 11, kind: input, shape index: {}]   ;;  %s4527_s12 = inlined_call_operand.vmem [shape: bf16[3,32,256], index: 12, kind: input, shape index: {}]   ;;  %s4528_s13 = inlined_call_operand.vmem [shape: bf16[3,32,256], index: 13, kind: input, shape index: {}]   ;;  %s4529_s14 = inlined_call_operand.vmem [shape: f32[3,1,256], index: 14, kind: input, shape index: {}]   ;;  %s4530_s15 = inlined_call_operand.vmem [shape: bf16[3,32,64], index: 15, kind: input, shape index: {}]   ;;  %s4531_s16 = inlined_call_operand.vmem [shape: bf16[3,64,32], index: 16, kind: input, shape index: {}]   ;;  %s4532_s17 = inlined_call_operand.vmem [shape: f32[3,1,32], index: 17, kind: input, shape index: {}]   ;;  %s4533_s18 = inlined_call_operand.vmem [shape: bf16[3,32,128], index: 18, kind: input, shape index: {}]   ;;  %s4534_s19 = inlined_call_operand.vmem [shape: f32[3,1,128], index: 19, kind: input, shape index: {}]   ;;  %s4535_s20 = inlined_call_operand.vmem [shape: bf16[3,128,32], index: 20, kind: input, shape index: {}]   ;;  %s4536_s21 = inlined_call_operand.vmem [shape: f32[3,1,32], index: 21, kind: input, shape index: {}]   ;;  %s4537_s22 = inlined_call_operand.hbm [shape: f32[9,64], index: 22, kind: output, shape index: {0}]   ;;  %s4538_s23 = inlined_call_operand.hbm [shape: f32[2,96], index: 23, kind: output, shape index: {1}]  }
   0x1   :  { %4548 = sst [smem:[#allocation10_spill]] %s4515_s0 }
   0x2   :  { %4549 = sst [smem:[#allocation11_spill]] %s4516_s1 }
   0x3   :  { %4550 = sst [smem:[#allocation12_spill]] %s4517_s2 }
   0x4   :  { %4551 = sst [smem:[#allocation13_spill]] %s4518_s3 }
   0x5   :  { %4552 = sst [smem:[#allocation14_spill]] %s4519_s4 }
   0x6   :  { %4553 = sst [smem:[#allocation15_spill]] %s4520_s5 }
   0x7   :  { %4554 = sst [smem:[#allocation16_spill]] %s4521_s6 }
   0x8   :  { %4555 = sst [smem:[#allocation17_spill]] %s4522_s7 }
   0x9   :  { %4556 = sst [smem:[#allocation18_spill]] %s4523_s8 }
   0xa   :  { %4557 = sst [smem:[#allocation19_spill]] %s4524_s9 }
   0xb   :  { %4558 = sst [smem:[#allocation20_spill]] %s4527_s12 }
   0xc   :  { %4559 = sst [smem:[#allocation21_spill]] %s4528_s13 }
   0xd   :  { %4560 = sst [smem:[#allocation22_spill]] %s4529_s14 }
   0xe   :  { %4561 = sst [smem:[#allocation23_spill]] %s4530_s15 }
   0xf   :  { %4562 = sst [smem:[#allocation24_spill]] %s4537_s22 }
  0x10   :  { %4563 = sst [smem:[#allocation25_spill]] %s4538_s23 }
  0x11   :  { %29 = vsyncpa [#allocation4], 0 }
  0x12   :  { %30 = vsyncpa [#allocation6], 0  ;;  %s3948_s4 = smov 0  }
  0x13 LB: > { %4564 = sst [smem:[#allocation9_spill]] %s3808_s4  ;;  %s3954_s30 = sadd.s32 4294967295, %s3808_s4   ;;  %s3808_s4 = sphi %s3948_s4, %s36_s4  }
  0x14   : > { %p3191_p0 = scmp.ge.s32.totalorder %s3808_s4, 1  ;;  %p715_p1 = scmp.lt.s32.totalorder %s3808_s4, 4 }
  0x16   : > { %p716_p2 = pnand %p3191_p0, %p715_p1 }
  0x17   : > { %p812_p3 = scmp.lt.s32.totalorder (!%p716_p2), %s3954_s30, 2  ;;  %s4565_s12 = sld [smem:[#allocation20_spill]] (!%p716_p2) }
  0x18   : > { %719 = sbr.rel (%p716_p2) target bundleno = 6020 (0x1784), region = 108  ;;  %s4566_s13 = sld [smem:[#allocation21_spill]] (!%p716_p2) }
  0x19   : > { %s4567_s14 = sld [smem:[#allocation22_spill]] (!%p716_p2)  ;;  %s4568_s15 = sld [smem:[#allocation23_spill]] (!%p716_p2) }
  0x1a   : > { %p3205_p4 = scmp.ne.s32.totalorder (!%p716_p2), %s3954_s30, 0 }
  0x1f   : > { %s3960_s24 = scalar_select %p812_p3, %s3954_s30, 2 }
  0x20   : > { %vm865_vm0 = vcmask (!%p3205_p4), 261120   ;;  %vm867_vm1 = vcmask (!%p3205_p4), 256000  }
  0x21   : > { %s3293_s25 = sshll.u32 %s3960_s24, 5  ;;  %s3196_s5 = sshll.u32 %s3960_s24, 1 }
  0x22   : > { %s3967_s2 = scalar_lea.vmem %s4565_s12, %s3293_s25  ;;  %s3972_s7 = scalar_lea.vmem %s4566_s13, %s3293_s25 }
  0x23   : > { %s3977_s3 = scalar_lea.vmem %s4567_s14, %s3196_s5  ;;  %s3295_s0 = sshll.u32 %s3960_s24, 4 }
  0x24   : > { %s3983_s22 = scalar_lea.vmem %s4568_s15, %s3295_s0  ;;  %s3988_s26 = scalar_lea.vmem %s4531_s16, %s3293_s25 }
  0x25   : > { %s838_s27 = scalar_lea.vmem %s4532_s17, %s3960_s24  ;;  %s3997_s5 = scalar_lea.vmem %s4533_s18, %s3295_s0 }
  0x26   : > { %s846_s23 = scalar_lea.vmem %s4534_s19, %s3960_s24  ;;  %s3298_s4 = sshll.u32 %s3960_s24, 6 }
  0x27   : > { %s4007_s8 = scalar_lea.vmem %s4535_s20, %s3298_s4  ;;  %s854_s12 = scalar_lea.vmem %s4536_s21, %s3960_s24 }
  0x28   : > { %862 = sbr.rel (%p3205_p4) target bundleno = 49 (0x31), region = 112  ;;  %s4569_s0 = sld [smem:[#allocation10_spill]] (!%p3205_p4) }
  0x2e   : > { %v863_v0 = vld [vmem:[%s4569_s0] sm:$0xff] (!%p3205_p4)  ;;  %v864_v1 = vld [vmem:[%s4569_s0 + $0x8] sm:$0x7] (!%p3205_p4) }
  0x2f   : > { %866 = vst.msk [vmem:[#allocation2] sm:$0xff] %vm865_vm0, %v863_v0 }
  0x30   : > { %868 = vst.msk [vmem:[#allocation2 + $0x8] sm:$0x7] %vm867_vm1, %v864_v1 }
  0x31 PF: > { %vm911_vm2 = vcmask 1044480   ;;  %vm912_vm3 = vcmask 1045504   ;;  %v3810_v4 = vmov 0.0   ;;  %v3811_v6 = vmov 65535   ;;  %s4570_s29 = sld [smem:[#allocation12_spill]]  ;;  %s4571_s28 = sld [smem:[#allocation11_spill]] }
  0x32   : > { %3391 = vmatprep.subr.bf16.mxu0 %v3810_v4  ;;  %3405 = vmatprep.subr.bf16.mxu1 %v3810_v4  ;;  %v913_v7 = vsel %vm911_vm2, 4294967295, %v3811_v6  ;;  %v1000_v8 = vsel %vm912_vm3, 4294967295, %v3811_v6  ;;  %vm3812_vm4 = vmmov 0   ;;  %vm901_vm5 = vcmask 89088   ;;  %s4572_s1 = sld [smem:[#allocation13_spill]]  ;;  %s4579_s6 = sld [smem:[#allocation14_spill]] }
  0x33   : > { %3393 = vmatprep.mubr.msk.bf16.mxu0 %vm3812_vm4, %v3810_v4  ;;  %3411 = vmatprep.mubr.msk.bf16.mxu1 %vm3812_vm4, %v3810_v4  ;;  %v4034_v9 = vsel %vm912_vm3, %v913_v7, 0  ;;  %vm999_vm6 = vcmask 1046528   ;;  %v3691_v56 = vld [vmem:[%s3972_s7 + $0x4] ss:$8 sps:$4 sm:$0xff]   ;;  %vm995_vm7 = vcmask 367616   ;;  %v3813_v62 = vmov 0  }
  0x34   : > { %v4104_v52 = vsel %vm999_vm6, %v1000_v8, 0  ;;  %v3689_v59 = vld [vmem:[%s3972_s7] ss:$8 sps:$4 sm:$0xff]   ;;  %v3694_v60 = vld [vmem:[%s3972_s7 + $0x14] ss:$8 sps:$4 sm:$0xff]   ;;  %3683 = vset.pattern.permute.xlu1 %v3813_v62  ;;  %3684 = vset.pattern.permute.xlu0 %v3813_v62  ;;  %vm1075_vm8 = vcmask 261120  }
  0x35   : > { %v3692_v61 = vld [vmem:[%s3972_s7 + $0x10] ss:$8 sps:$4 sm:$0xff]   ;;  %v3697_v63 = vld [vmem:[%s3967_s2 + $0x4] ss:$8 sps:$4 sm:$0xff]   ;;  %v3695_v7 = vld [vmem:[%s3967_s2] ss:$8 sps:$4 sm:$0xff]  }
  0x36   : > { %vm1571_vm13 = vcmask 362496   ;;  %vm1455_vm14 = vcmask 523264   ;;  %vm1894_vm15 = vcmask 1042432   ;;  %vm3817_vm0 = vmmov 1   ;;  %s4580_s4 = sld [smem:[#allocation15_spill]]  ;;  %p3280_p5 = scmp.ne.s32.totalorder %s3954_s30, 2 }
  0x37   : > { %v4022_v3 = vld [vmem:[#allocation2 + $0x8] sm:$0x7]  ;;  %v4041_v11 = vld [vmem:[%s4570_s29] sm:$0xff]   ;;  %v4060_v13 = vld [vmem:[%s4570_s29 + $0x10] sm:$0x7f]   ;;  %vm1968_vm2 = vcmask 254976  }
  0x38   : > { %v4020_v2 = vld [vmem:[#allocation2] sm:$0xff]  ;;  %v4051_v12 = vld [vmem:[%s4570_s29 + $0x8] sm:$0xff]   ;;  %v4081_v24 = vld [vmem:[%s4571_s28 + $0x10] sm:$0xff]  ;;  %vm1974_vm3 = vcmask 15360   ;;  %vm1981_vm6 = vcmask 1041408   ;;  %s4583_s15 = sld [smem:[#allocation19_spill]] (!%p3280_p5) }
  0x39   : > { %v4027_v5 = vpack.c.bf16 %v4022_v3, %v4020_v2  ;;  %v4069_v14 = vld [vmem:[%s4571_s28] sm:$0xff]  ;;  %v4074_v16 = vld [vmem:[%s4571_s28 + $0x8] sm:$0xff]  ;;  %v4086_v28 = vld [vmem:[%s4571_s28 + $0x18] sm:$0xff]  ;;  %s4584_s13 = sld [smem:[#allocation18_spill]] (!%p3280_p5)  ;;  %s4585_s7 = sld [smem:[#allocation17_spill]] (!%p3280_p5) }
  0x3a   : > { %v4094_v37 = vld [vmem:[%s4571_s28 + $0x20] sm:$0xff]  ;;  %v4099_v41 = vld [vmem:[%s4571_s28 + $0x28] sm:$0x1f]  ;;  %vm4317_vm1 = vmpackc.low %vm1894_vm15, %vm3817_vm0 }
  0x3b   : > { %v916_v10 = vand.u32 %v4034_v9, %v4027_v5  ;;  %v4109_v54 = vld [vmem:[%s4572_s1] sm:$0xf]  ;;  %v4114_v55 = vld [vmem:[%s4572_s1 + $0x4] sm:$0x3] }
  0x3c   : > { %v3212_v58 = vcombine.low %v4109_v54, %v4114_v55  ;;  %vm1558_vm9 = vcmp.gt.bf16.partialorder %v4109_v54, 1056980736  ;;  %vm1559_vm10 = vcmp.gt.bf16.partialorder %v4114_v55, 1056980736  ;;  %s4581_s25 = smov %s4580_s4 }
  0x3d   : > { %3392 = vmatpush3.bf16.msra.mxu0 %v916_v10 }
  0x3e   : > { %3415 = vmatprep.subr.bf16.mxu0 %v3810_v4 }
  0x40   : > { %3394 = vmatmul.mubr.msk.bf16.vlgmr.msra.gmra.mrb[0].mxu0 %vm901_vm5, %v4041_v11 }
  0x41   : > { %3397 = vmatprep.mubr.msk.bf16.mxu0 %vm3812_vm4, %v3810_v4 }
  0x48   : > { %3398 = vmatmul.mubr.msk.bf16.gmra.mrb[4].mxu0 %vm901_vm5, %v4051_v12 }
  0x49   : > { %3401 = vmatprep.mubr.msk.bf16.mxu0 %vm3812_vm4, %v3810_v4 }
  0x50   : > { %3402 = vmatmul.mubr.msk.bf16.gmra.mrb[8].mxu0 %vm901_vm5, %v4060_v13 }
  0x51   : > { %3419 = vmatprep.mubr.msk.bf16.mxu0 %vm3812_vm4, %v3810_v4 }
 0x113   : > { %v952_v15 = vpop.f32.mrb[0].mxu0 }
 0x114   : > { %v953_v17 = vadd.f32 %v952_v15, %v4069_v14  ;;  %v3395_v18 = vpop.f32.mrb[1].mxu0  ;;  %v3700_v15 = vld [vmem:[%s3967_s2 + $0x14] ss:$8 sps:$4 sm:$0xff]  }
 0x115   : > { %v955_v19 = vpop.f32.mrb[2].mxu0  ;;  %v3701_v18 = vld [vmem:[%s3983_s22] sm:$0xff]  }
 0x116   : > { %v975_v20 = vmax.f32 %v953_v17, 0.0  ;;  %v956_v21 = vadd.f32 %v955_v19, %v4074_v16  ;;  %v3396_v22 = vpop.f32.mrb[3].mxu0  ;;  %v3698_v17 = vld [vmem:[%s3967_s2 + $0x10] ss:$8 sps:$4 sm:$0xff]   ;;  %3416 = vmatpush3.bf16.msra.mxu0 %v3701_v18  ;;  %v3702_v19 = vld [vmem:[%s3983_s22 + $0x8] sm:$0xff]   ;;  %s3814_s22 = smov 64  }
 0x117   : > { %3417 = vmatprep.subr.bf16.mxu0 %v3810_v4  ;;  %s3815_s2 = smov 96  }
 0x118   : > { %v976_v23 = vmax.f32 %v956_v21, 0.0  ;;  %v981_v25 = vadd.f32 1e-07, %v975_v20  ;;  %v1207_v20 = vpack.c.bf16 %v4074_v16, %v4069_v14  ;;  %v1209_v21 = vpack.c.bf16 %v4099_v41, %v4094_v37 }
 0x119   : > { %v1189_v14 = vlaneseq }
 0x11a   : > { %v982_v26 = vadd.f32 1e-07, %v976_v23  ;;  %3418 = vmatpush3.bf16.msra.mxu0 %v3702_v19  ;;  %v1187_v23 = vld [vmem:[%s3977_s3] sm:$0x3] }
 0x11b   : > { %v960_v27 = vpop.f32.mrb[4].mxu0  ;;  %3445 = vmatprep.subr.bf16.mxu0 %v3810_v4  ;;  %v1190_v16 = vshrl.u32 %v1189_v14, 7 }
 0x11c   : > { %v961_v29 = vadd.f32 %v960_v27, %v4081_v24  ;;  %v3399_v30 = vpop.f32.mrb[5].mxu0  ;;  %v987_v31 = vpack.c.bf16 %v982_v26, %v981_v25 }
 0x11d   : > { %v963_v32 = vpop.f32.mrb[6].mxu0  ;;  %3420 = vmatmul.mubr.msk.bf16.vlgmr.msra.gmra.mrb[12].mxu0 %vm1075_vm8, %v1207_v20  ;;  %v1191_v22 = vsub.s32 0, %v1190_v16  ;;  %v1195_v25 = vsub.s32 1, %v1190_v16 }
 0x11e   : > { %v977_v33 = vmax.f32 %v961_v29, 0.0  ;;  %v964_v34 = vadd.f32 %v963_v32, %v4086_v28  ;;  %v3400_v35 = vpop.f32.mrb[7].mxu0  ;;  %3406 = vmatpush3.bf16.msra.mxu1 %v987_v31  ;;  %3423 = vmatprep.mubr.msk.bf16.mxu0 %vm3812_vm4, %v3810_v4 }
 0x11f   : > { %3407 = vmatprep.subr.bf16.mxu1 %v3810_v4  ;;  %v1192_v26 = vrot.slane %v1187_v23, %v1191_v22  ;;  %v1196_v27 = vrot.slane %v1187_v23, %v1195_v25 }
 0x120   : > { %v978_v36 = vmax.f32 %v964_v34, 0.0  ;;  %v983_v38 = vadd.f32 1e-07, %v977_v33 }
 0x122   : > { %v984_v39 = vadd.f32 1e-07, %v978_v36 }
 0x123   : > { %v968_v40 = vpop.f32.mrb[8].mxu0 }
 0x124   : > { %v988_v42 = vpack.c.bf16 %v984_v39, %v983_v38  ;;  %v969_v43 = vadd.f32 %v968_v40, %v4094_v37  ;;  %v3403_v44 = vpop.f32.mrb[9].mxu0 }
 0x125   : > { %v971_v45 = vpop.f32.mrb[10].mxu0 }
 0x126   : > { %v979_v46 = vmax.f32 %v969_v43, 0.0  ;;  %v972_v47 = vadd.f32 %v971_v45, %v4099_v41  ;;  %v3404_v48 = vpop.f32.mrb[11].mxu0  ;;  %3408 = vmatpush3.bf16.msra.mxu1 %v988_v42 }
 0x127   : > { %3409 = vmatprep.subr.bf16.mxu1 %v3810_v4 }
 0x128   : > { %v980_v49 = vmax.f32 %v972_v47, 0.0  ;;  %v985_v50 = vadd.f32 1e-07, %v979_v46 }
 0x12a   : > { %v986_v51 = vadd.f32 1e-07, %v980_v49 }
 0x12c   : > { %v989_v53 = vpack.c.bf16 %v986_v51, %v985_v50 }
 0x12e   : > { %v1003_v57 = vand.u32 %v4104_v52, %v989_v53 }
 0x130   : > { %3410 = vmatpush3.bf16.msra.mxu1 %v1003_v57 }
 0x131   : > { %1079 = vmatprep.subr.bf16.mxu1 %v3691_v56 }
 0x133   : > { %3412 = vmatmul.mubr.msk.bf16.vlgmr.msra.gmra.mrb[0].mxu1 %vm995_vm7, %v3212_v58 }
 0x134   : > { %1080 = vmatpush1.bf16.msra.mxu1 %v3689_v59  ;;  %1111 = vmatprep.mubr.bf16.mxu1 %v3813_v62 }
 0x135   : > { %1081 = vmatprep.subr.bf16.mxu1 %v3694_v60 }
 0x138   : > { %1082 = vmatpush1.bf16.msra.mxu1 %v3692_v61 }
 0x139   : > { %1144 = vmatprep.subr.bf16.mxu1 %v3697_v63 }
 0x1f0   : > { %v1265_v38 = vpop.f32.mrb[12].mxu0 }
 0x1f1   : > { %v3421_v39 = vpop.f32.mrb[13].mxu0 }
 0x1f2   : > { %v1268_v40 = vpop.f32.mrb[14].mxu0 }
 0x1f3   : > { %v3422_v41 = vpop.f32.mrb[15].mxu0 }
 0x206   : > { %v1039_v0 = vpop.f32.mrb[0].mxu1 }
 0x207   : > { %v3413_v1 = vpop.f32.mrb[1].mxu1 }
 0x208   : > { %v1042_v6 = vpop.f32.mrb[2].mxu1 }
 0x209   : > { %v1054_v8 = vpack.c.bf16 %v1042_v6, %v1039_v0  ;;  %v3414_v10 = vpop.f32.mrb[3].mxu1 }
 0x20b   : > { %3218 = vmatmul.mubr.msk.bf16.vlgmr.msra.gmra.mrb[4].mxu1 %vm1075_vm8, %v1054_v8 }
 0x20c   : > { %1145 = vmatpush1.bf16.msra.mxu1 %v3695_v7  ;;  %1176 = vmatprep.mubr.bf16.mxu1 %v3813_v62 }
 0x20d   : > { %1146 = vmatprep.subr.bf16.mxu1 %v3700_v15 }
 0x210   : > { %1147 = vmatpush1.bf16.msra.mxu1 %v3698_v17 }
 0x211   : > { %3431 = vmatprep.subr.bf16.mxu1 %v3810_v4 }
 0x217   : > { %3223 = vmatmul.mubr.msk.bf16.vlgmr.msra.gmra.mrb[4].mxu1 %vm1075_vm8, %v4027_v5  ;;  %v1208_v5 = vpack.c.bf16 %v4086_v28, %v4081_v24 }
 0x218   : > { %3433 = vmatprep.mubr.msk.bf16.mxu1 %vm3812_vm4, %v3810_v4 }
 0x219   : > { %3424 = vmatmul.mubr.msk.bf16.gmra.mrb[16].mxu0 %vm1075_vm8, %v1208_v5 }
 0x21a   : > { %3427 = vmatprep.mubr.msk.bf16.mxu0 %vm3812_vm4, %v3810_v4 }
 0x221   : > { %3428 = vmatmul.mubr.msk.bf16.gmra.mrb[20].mxu0 %vm1075_vm8, %v1209_v21 }
 0x222   : > { %3447 = vmatprep.mubr.msk.bf16.mxu0 %vm3812_vm4, %v3810_v4 }
 0x2ea   : > { %v1178_v24 = vpop.f32.mrb[4].mxu1 }
 0x2eb   : > { %v1180_v28 = vpop.f32.mrb[5].mxu1  ;;  %v1199_v30 = vadd.f32 %v1192_v26, %v1178_v24 }
 0x2ec   : > { %v1182_v29 = vpop.f32.mrb[6].mxu1  ;;  %v1200_v33 = vadd.f32 %v1196_v27, %v1180_v28  ;;  %v1273_v42 = vpop.f32.mrb[16].mxu0 }
 0x2ed   : > { %v1201_v31 = vadd.f32 %v1192_v26, %v1182_v29  ;;  %v1184_v32 = vpop.f32.mrb[7].mxu1  ;;  %v3425_v43 = vpop.f32.mrb[17].mxu0 }
 0x2ee   : > { %v1202_v34 = vadd.f32 %v1196_v27, %v1184_v32  ;;  %v1276_v44 = vpop.f32.mrb[18].mxu0 }
 0x2ef   : > { %v4158_v35 = vpack.c.bf16 %v1201_v31, %v1199_v30  ;;  %v3426_v45 = vpop.f32.mrb[19].mxu0 }
 0x2f0   : > { %v4160_v36 = vpack.c.bf16 %v1202_v34, %v1200_v33 }
 0x2f1   : > { %1290 = vrot.lane.b32.xlu0 %v4158_v35, %s3814_s22 }
 0x2f2   : > { %v1354_v37 = vand.u32 %v4160_v36, %v4034_v9 }
 0x2f4   : > { %3446 = vmatpush3.bf16.msra.mxu0 %v1354_v37  ;;  %v1281_v46 = vpop.f32.mrb[20].mxu0 }
 0x2f5   : > { %3471 = vmatprep.subr.bf16.mxu0 %v3810_v4  ;;  %v3429_v47 = vpop.f32.mrb[21].mxu0 }
 0x2f6   : > { %v1284_v48 = vpop.f32.mrb[22].mxu0 }
 0x2f7   : > { %3448 = vmatmul.mubr.msk.bf16.vlgmr.msra.gmra.mrb[24].mxu0 %vm901_vm5, %v4041_v11  ;;  %v3430_v49 = vpop.f32.mrb[23].mxu0 }
 0x2f8   : > { %3451 = vmatprep.mubr.msk.bf16.mxu0 %vm3812_vm4, %v3810_v4  ;;  %v1560_v49 = vsel %vm1558_vm9, 65537, %v3813_v62  ;;  %vm3017_vm9 = vcmask (!%p3280_p5), 516096  }
 0x2ff   : > { %3452 = vmatmul.mubr.msk.bf16.gmra.mrb[28].mxu0 %vm901_vm5, %v4051_v12 }
 0x300   : > { %3455 = vmatprep.mubr.msk.bf16.mxu0 %vm3812_vm4, %v3810_v4 }
 0x307   : > { %3456 = vmatmul.mubr.msk.bf16.gmra.mrb[32].mxu0 %vm901_vm5, %v4060_v13 }
 0x308   : > { %3477 = vmatprep.mubr.msk.bf16.mxu0 %vm3812_vm4, %v3810_v4 }
 0x363   : > { %v1291_v50 = vpop.permute.xlu0 %1290 }
 0x364   : > { %v1293_v51 = vand.u32 %v1291_v50, %v4034_v9  ;;  %v1561_v50 = vsel %vm1559_vm10, 65537, %v3813_v62 }
 0x366   : > { %3432 = vmatpush3.bf16.msra.mxu1 %v1293_v51  ;;  %v1562_v51 = vunpack.c.l.b16 %v1560_v49 }
 0x367   : > { %3459 = vmatprep.subr.bf16.mxu1 %v3810_v4 }
 0x368   : > { %vm4226_vm11 = vcmp.ne.s32.totalorder %v1562_v51, 0 }
 0x369   : > { %3434 = vmatmul.mubr.msk.bf16.vlgmr.msra.gmra.mrb[8].mxu1 %vm901_vm5, %v4041_v11 }
 0x36a   : > { %3437 = vmatprep.mubr.msk.bf16.mxu1 %vm3812_vm4, %v3810_v4 }
 0x371   : > { %3438 = vmatmul.mubr.msk.bf16.gmra.mrb[12].mxu1 %vm901_vm5, %v4051_v12 }
 0x372   : > { %3441 = vmatprep.mubr.msk.bf16.mxu1 %vm3812_vm4, %v3810_v4 }
 0x379   : > { %3442 = vmatmul.mubr.msk.bf16.gmra.mrb[16].mxu1 %vm901_vm5, %v4060_v13 }
 0x37a   : > { %3467 = vmatprep.mubr.msk.bf16.mxu1 %vm3812_vm4, %v3810_v4 }
 0x3ca   : > { %v1390_v53 = vpop.f32.mrb[24].mxu0 }
 0x3cb   : > { %v1391_v56 = vadd.f32 %v1390_v53, %v1265_v38  ;;  %v3449_v57 = vpop.f32.mrb[25].mxu0  ;;  %v1563_v53 = vunpack.c.l.b16 %v1561_v50 }
 0x3cc   : > { %v1393_v58 = vpop.f32.mrb[26].mxu0 }
 0x3cd   : > { %v1394_v11 = vadd.f32 %v1393_v58, %v1268_v40  ;;  %v3450_v59 = vpop.f32.mrb[27].mxu0  ;;  %vm4230_vm12 = vcmp.ne.s32.totalorder %v1563_v53, 0 }
 0x3cf   : > { %v4193_v60 = vpack.c.bf16 %v1394_v11, %v1391_v56 }
 0x3d2   : > { %v1398_v61 = vpop.f32.mrb[28].mxu0 }
 0x3d3   : > { %v1399_v63 = vadd.f32 %v1398_v61, %v1273_v42  ;;  %v3453_v12 = vpop.f32.mrb[29].mxu0 }
 0x3d4   : > { %v1401_v0 = vpop.f32.mrb[30].mxu0 }
 0x3d5   : > { %v1402_v1 = vadd.f32 %v1401_v0, %v1276_v44  ;;  %v3454_v6 = vpop.f32.mrb[31].mxu0 }
 0x3d6   : > { %v4245_v6 = vld [vmem:[%s3988_s26 + $0x8] sm:$0xff]  }
 0x3d7   : > { %v4195_v7 = vpack.c.bf16 %v1402_v1, %v1399_v63  ;;  %v4241_v1 = vld [vmem:[%s3988_s26] sm:$0xff]  }
 0x3d8   : > { %3460 = vmatpush3.bf16.msra.mxu1 %v4241_v1 }
 0x3d9   : > { %3461 = vmatprep.subr.bf16.mxu1 %v3810_v4 }
 0x3da   : > { %v1406_v13 = vpop.f32.mrb[32].mxu0 }
 0x3db   : > { %v1407_v8 = vadd.f32 %v1406_v13, %v1281_v46  ;;  %v3457_v10 = vpop.f32.mrb[33].mxu0  ;;  %v4250_v13 = vld [vmem:[%s3988_s26 + $0x10] sm:$0xff]  }
 0x3dc   : > { %v1409_v15 = vpop.f32.mrb[34].mxu0  ;;  %3462 = vmatpush3.bf16.msra.mxu1 %v4245_v6 }
 0x3dd   : > { %v1410_v17 = vadd.f32 %v1409_v15, %v1284_v48  ;;  %v3458_v18 = vpop.f32.mrb[35].mxu0  ;;  %3463 = vmatprep.subr.bf16.mxu1 %v3810_v4 }
 0x3df   : > { %v4197_v19 = vpack.c.bf16 %v1410_v17, %v1407_v8 }
 0x3e0   : > { %3464 = vmatpush3.bf16.msra.mxu1 %v4250_v13 }
 0x3e1   : > { %3465 = vmatprep.subr.bf16.mxu1 %v3810_v4 }
 0x43c   : > { %v1329_v20 = vpop.f32.mrb[8].mxu1 }
 0x43d   : > { %v1330_v5 = vadd.f32 %v1329_v20, %v1265_v38  ;;  %v3435_v21 = vpop.f32.mrb[9].mxu1 }
 0x43e   : > { %v1332_v14 = vpop.f32.mrb[10].mxu1 }
 0x43f   : > { %v1333_v16 = vadd.f32 %v1332_v14, %v1268_v40  ;;  %v3436_v22 = vpop.f32.mrb[11].mxu1 }
 0x441   : > { %v1500_v23 = vpack.c.bf16 %v1333_v16, %v1330_v5 }
 0x443   : > { %1694 = vrot.lane.b32.xlu0 %v1500_v23, %s3815_s2  ;;  %v1507_v25 = vsel %vm1075_vm8, %v1500_v23, 0 }
 0x444   : > { %v1337_v26 = vpop.f32.mrb[12].mxu1  ;;  %3472 = vmatpush3.bf16.xpose.msra.mxu0 %v1507_v25 }
 0x445   : > { %v1338_v24 = vadd.f32 %v1337_v26, %v1273_v42  ;;  %v3439_v27 = vpop.f32.mrb[13].mxu1  ;;  %3473 = vmatprep.subr.bf16.mxu0 %v3810_v4 }
 0x446   : > { %v1340_v28 = vpop.f32.mrb[14].mxu1 }
 0x447   : > { %v1341_v29 = vadd.f32 %v1340_v28, %v1276_v44  ;;  %v3440_v30 = vpop.f32.mrb[15].mxu1  ;;  %1689 = vrot.lane.b32.xlu0 %v4158_v35, %s3815_s2 }
 0x449   : > { %v1501_v31 = vpack.c.bf16 %v1341_v29, %v1338_v24 }
 0x44b   : > { %1696 = vrot.lane.b32.xlu1 %v1501_v31, %s3815_s2  ;;  %v1510_v32 = vsel %vm1075_vm8, %v1501_v31, 0 }
 0x44c   : > { %v1345_v33 = vpop.f32.mrb[16].mxu1  ;;  %3474 = vmatpush3.bf16.xpose.msra.mxu0 %v1510_v32  ;;  %v4264_v32 = vld [vmem:[%s3988_s26 + $0x18] sm:$0xff]   ;;  %s3822_s26 = smov (!%p3280_p5), 64  }
 0x44d   : > { %v1346_v34 = vadd.f32 %v1345_v33, %v1281_v46  ;;  %v3443_v37 = vpop.f32.mrb[17].mxu1  ;;  %3475 = vmatprep.subr.bf16.mxu0 %v3810_v4  ;;  %3466 = vmatpush3.bf16.msra.mxu1 %v4264_v32 }
 0x44e   : > { %v1348_v38 = vpop.f32.mrb[18].mxu1  ;;  %3481 = vmatprep.subr.bf16.mxu1 %v3810_v4 }
 0x44f   : > { %v1349_v39 = vadd.f32 %v1348_v38, %v1284_v48  ;;  %v3444_v40 = vpop.f32.mrb[19].mxu1 }
 0x451   : > { %v1502_v41 = vpack.c.bf16 %v1349_v39, %v1346_v34 }
 0x453   : > { %1698 = vrot.lane.b32.xlu1 %v1502_v41, %s3815_s2  ;;  %v1513_v42 = vsel %vm1075_vm8, %v1502_v41, 0 }
 0x454   : > { %3476 = vmatpush3.bf16.xpose.msra.mxu0 %v1513_v42 }
 0x455   : > { %3499 = vmatprep.subr.bf16.mxu0 %v3810_v4 }
 0x45b   : > { %3478 = vmatmul.mubr.msk.bf16.vlgmr.msra.gmra.mrb[36].mxu0 %vm1075_vm8, %v4158_v35 }
 0x45c   : > { %3505 = vmatprep.mubr.msk.bf16.mxu0 %vm3812_vm4, %v3810_v4 }
 0x4b5   : > { %v1695_v43 = vpop.permute.xlu0 %1694 }
 0x4b6   : > { %v1704_v44 = vsel %vm1075_vm8, %v1695_v43, 0  ;;  %v1599_v43 = vand.u32 %v4197_v19, %v4104_v52 }
 0x4b7   : > { %3500 = vmatpush3.bf16.xpose.msra.mxu0 %v1704_v44 }
 0x4b8   : > { %3501 = vmatprep.subr.bf16.mxu0 %v3810_v4 }
 0x4b9   : > { %v1690_v35 = vpop.permute.xlu0 %1689 }
 0x4bd   : > { %v1697_v45 = vpop.permute.xlu1 %1696 }
 0x4be   : > { %v1707_v46 = vsel %vm1075_vm8, %v1697_v45, 0 }
 0x4bf   : > { %3502 = vmatpush3.bf16.xpose.msra.mxu0 %v1707_v46 }
 0x4c0   : > { %3503 = vmatprep.subr.bf16.mxu0 %v3810_v4 }
 0x4c5   : > { %v1699_v47 = vpop.permute.xlu1 %1698 }
 0x4c6   : > { %v1710_v48 = vsel %vm1075_vm8, %v1699_v47, 0 }
 0x4c7   : > { %3504 = vmatpush3.bf16.xpose.msra.mxu0 %v1710_v48 }
 0x4ce   : > { %3506 = vmatmul.mubr.msk.bf16.vlgmr.msra.gmra.mrb[40].mxu0 %vm1075_vm8, %v1690_v35 }
 0x4cf   : > { %3531 = vmatprep.mubr.msk.f32.mxu0 %vm3812_vm4, %v3810_v4 }
 0x52e   : > { %v1549_v56 = vpop.f32.mrb[36].mxu0 }
 0x52f   : > { %v1556_v58 = vmul.f32 0.17677669, %v1549_v56  ;;  %v3479_v11 = vpop.f32.mrb[37].mxu0 }
 0x530   : > { %v1552_v59 = vpop.f32.mrb[38].mxu0 }
 0x531   : > { %v1557_v55 = vmul.f32 0.17677669, %v1552_v59  ;;  %v3480_v61 = vpop.f32.mrb[39].mxu0  ;;  %v1566_v62 = vsel %vm4226_vm11, %v1556_v58, -1e+30 }
 0x532   : > { %v1568_v63 = vsel %vm995_vm7, %v1566_v62, -inf }
 0x533   : > { %1569 = vmax.xlane.f32.xlu1 %v1568_v63  ;;  %v1567_v12 = vsel %vm4230_vm12, %v1557_v55, -1e+30 }
 0x534   : > { %v1572_v0 = vsel %vm1571_vm13, %v1567_v12, -inf }
 0x535   : > { %1573 = vmax.xlane.f32.xlu0 %v1572_v0 }
 0x5a1   : > { %v1746_v8 = vpop.f32.mrb[40].mxu0 }
 0x5a2   : > { %v3507_v10 = vpop.f32.mrb[41].mxu0  ;;  %v1753_v23 = vmul.f32 0.17677669, %v1746_v8 }
 0x5a3   : > { %v1749_v15 = vpop.f32.mrb[42].mxu0 }
 0x5a4   : > { %v3508_v17 = vpop.f32.mrb[43].mxu0  ;;  %v1754_v27 = vmul.f32 0.17677669, %v1749_v15  ;;  %v1755_v28 = vsel %vm4226_vm11, %v1753_v23, -1e+30 }
 0x5a5   : > { %v1757_v29 = vsel %vm995_vm7, %v1755_v28, -inf }
 0x5a6   : > { %v1756_v30 = vsel %vm4230_vm12, %v1754_v27, -1e+30 }
 0x5a7   : > { %v1760_v31 = vsel %vm1571_vm13, %v1756_v30, -inf }
 0x5c0   : > { %v1570_v18 = vpop.xlane.xlu1 %1569 }
 0x5c1   : > { %v1575_v20 = vsub.f32 %v1566_v62, %v1570_v18 }
 0x5c2   : > { %v1574_v5 = vpop.xlane.xlu0 %1573 }
 0x5c3   : > { %v1577_v21 = vmul.f32 1.442695, %v1575_v20  ;;  %v1576_v14 = vsub.f32 %v1567_v12, %v1574_v5 }
 0x5c5   : > { %3717 = vpow2.f32 %v1577_v21  ;;  %v1579_v16 = vmul.f32 1.442695, %v1576_v14 }
 0x5c7   : > { %3719 = vpow2.f32 %v1579_v16 }
 0x5cf   : > { %v3718_v22 = vpop.eup %3717 }
 0x5d0   : > { %v1581_v25 = vsel %vm995_vm7, %v3718_v22, 0.0 }
 0x5d1   : > { %v3720_v26 = vpop.eup %3719  ;;  %1582 = vadd.xlane.f32.xlu0 %v1581_v25 }
 0x5d2   : > { %v1584_v24 = vsel %vm1571_vm13, %v3720_v26, 0.0 }
 0x5d3   : > { %1585 = vadd.xlane.f32.xlu1 %v1584_v24  ;;  %v3816_v24 = vmov 0.0|0.0  }
 0x5d4   : > { %3621 = vmatprep.subr.bf16.mxu0 %v3816_v24 }
 0x5d7   : > { %1758 = vmax.xlane.f32.xlu1 %v1757_v29 }
 0x5db   : > { %1761 = vmax.xlane.f32.xlu1 %v1760_v31 }
 0x5e7   : > { %1429 = vrot.lane.b32.xlu0 %v4160_v36, %s3814_s22  ;;  %s4582_s22 = sld [smem:[#allocation16_spill]] }
 0x5eb   : > { %1785 = vrot.lane.b32.xlu0 %v4195_v7, %s3815_s2 }
 0x5ef   : > { %1787 = vrot.lane.b32.xlu0 %v4197_v19, %s3815_s2 }
 0x65e   : > { %v1583_v33 = vpop.xlane.xlu0 %1582 }
 0x65f   : > { %3721 = vrcp.f32 %v1583_v33 }
 0x660   : > { %v1586_v34 = vpop.xlane.xlu1 %1585 }
 0x661   : > { %3723 = vrcp.f32 %v1586_v34 }
 0x662   : > { %v1430_v37 = vpop.permute.xlu0 %1429 }
 0x663   : > { %3468 = vmatmul.mubr.msk.bf16.vlgmr.msra.gmra.mrb[20].mxu1 %vm1455_vm14, %v1430_v37  ;;  %v2776_v37 = vld [vmem:[%s4585_s7] sm:$0x1] (!%p3280_p5) }
 0x664   : > { %3482 = vmatpush3.bf16.msra.mxu1 %v4193_v60  ;;  %v1759_v38 = vpop.xlane.xlu1 %1758  ;;  %3487 = vmatprep.mubr.msk.bf16.mxu1 %vm3812_vm4, %v3810_v4 }
 0x665   : > { %v1763_v36 = vsub.f32 %v1755_v28, %v1759_v38  ;;  %3483 = vmatprep.subr.bf16.mxu1 %v3810_v4 }
 0x666   : > { %v1786_v55 = vpop.permute.xlu0 %1785 }
 0x667   : > { %v1765_v39 = vmul.f32 1.442695, %v1763_v36  ;;  %v4326_v36 = vld [vmem:[%s4579_s6] sm:$0x3] }
 0x668   : > { %3484 = vmatpush3.bf16.msra.mxu1 %v4195_v7  ;;  %v1762_v40 = vpop.xlane.xlu1 %1761 }
 0x669   : > { %v3722_v41 = vpop.eup %3721  ;;  %3725 = vpow2.f32 %v1765_v39  ;;  %v1764_v42 = vsub.f32 %v1756_v30, %v1762_v40  ;;  %3485 = vmatprep.subr.bf16.mxu1 %v3810_v4  ;;  %v4334_v40 = vld [vmem:[%s4580_s4] sm:$0xff] }
 0x66a   : > { %v1589_v46 = vmul.f32 %v3722_v41, %v3718_v22  ;;  %v1788_v12 = vpop.permute.xlu0 %1787  ;;  %v1888_v41 = vld [vmem:[%s4582_s22] sm:$0x3] }
 0x66b   : > { %v3724_v44 = vpop.eup %3723  ;;  %v1767_v45 = vmul.f32 1.442695, %v1764_v42 }
 0x66c   : > { %v1590_v47 = vmul.f32 %v3724_v44, %v3720_v26  ;;  %3486 = vmatpush3.bf16.msra.mxu1 %v1599_v43 }
 0x66d   : > { %3727 = vpow2.f32 %v1767_v45  ;;  %3491 = vmatprep.subr.bf16.mxu1 %v3810_v4  ;;  %v4349_v45 = vld [vmem:[%s4581_s25 + $0x8] sm:$0x7] }
 0x66e   : > { %v1591_v48 = vpack.c.bf16 %v1590_v47, %v1589_v46 }
 0x670   : > { %3488 = vmatmul.mubr.msk.bf16.vlgmr.msra.gmra.mrb[24].mxu1 %vm995_vm7, %v1591_v48 }
 0x671   : > { %3492 = vmatpush3.bf16.msra.mxu1 %v4241_v1  ;;  %3495 = vmatprep.mubr.msk.bf16.mxu1 %vm3812_vm4, %v3810_v4 }
 0x672   : > { %3493 = vmatprep.subr.bf16.mxu1 %v3810_v4 }
 0x673   : > { %v3726_v7 = vpop.eup %3725 }
 0x674   : > { %v1769_v19 = vsel %vm995_vm7, %v3726_v7, 0.0 }
 0x675   : > { %1770 = vadd.xlane.f32.xlu1 %v1769_v19  ;;  %3494 = vmatpush3.bf16.msra.mxu1 %v4245_v6  ;;  %v1795_v6 = vand.u32 %v1788_v12, %v4104_v52  ;;  %v3235_v52 = vld [vmem:[%s838_s27] ss:$0 sm:$0xff]  ;;  %v3710_v12 = vld [vmem:[%s4007_s8 + $0x8] sm:$0xff]  }
 0x676   : > { %3509 = vmatprep.subr.bf16.mxu1 %v3810_v4 }
 0x677   : > { %v3728_v35 = vpop.eup %3727 }
 0x678   : > { %v1772_v49 = vsel %vm1571_vm13, %v3728_v35, 0.0 }
 0x679   : > { %1773 = vadd.xlane.f32.xlu1 %v1772_v49 }
 0x68a   : > { %1783 = vrot.lane.b32.xlu1 %v4193_v60, %s3815_s2 }
 0x702   : > { %v1771_v53 = vpop.xlane.xlu1 %1770 }
 0x706   : > { %v1774_v58 = vpop.xlane.xlu1 %1773 }
 0x707   : > { %3729 = vrcp.f32 %v1774_v58 }
 0x708   : > { %3731 = vrcp.f32 %v1771_v53 }
 0x709   : > { %3733 = vrcp.f32 %v1888_v41 }
 0x70a   : > { %v1784_v63 = vpop.permute.xlu1 %1783 }
 0x711   : > { %v3730_v60 = vpop.eup %3729 }
 0x712   : > { %v3732_v0 = vpop.eup %3731  ;;  %v1778_v1 = vmul.f32 %v3730_v60, %v3728_v35  ;;  %v3709_v60 = vld [vmem:[%s4007_s8] sm:$0xff]  }
 0x713   : > { %v1777_v8 = vmul.f32 %v3732_v0, %v3726_v7  ;;  %v4343_v42 = vpop.eup %3733  ;;  %v3711_v0 = vld [vmem:[%s4007_s8 + $0x10] sm:$0xff]  }
 0x715   : > { %v1779_v10 = vpack.c.bf16 %v1778_v1, %v1777_v8  ;;  %v3712_v1 = vld [vmem:[%s4007_s8 + $0x18] sm:$0xff]  }
 0x736   : > { %v1493_v50 = vpop.f32.mrb[20].mxu1 }
 0x737   : > { %v3469_v51 = vpop.f32.mrb[21].mxu1  ;;  %v1494_v15 = vadd.f32 %v3235_v52, %v1493_v50 }
 0x738   : > { %v1496_v56 = vpop.f32.mrb[22].mxu1 }
 0x739   : > { %v3470_v57 = vpop.f32.mrb[23].mxu1  ;;  %v1497_v18 = vadd.f32 %v3235_v52, %v1496_v56 }
 0x743   : > { %v1635_v11 = vpop.f32.mrb[24].mxu1 }
 0x744   : > { %v3489_v59 = vpop.f32.mrb[25].mxu1 }
 0x745   : > { %v1638_v54 = vpop.f32.mrb[26].mxu1 }
 0x746   : > { %v1642_v61 = vpack.c.bf16 %v1638_v54, %v1635_v11  ;;  %v3490_v62 = vpop.f32.mrb[27].mxu1 }
 0x748   : > { %3496 = vmatmul.mubr.msk.bf16.vlgmr.msra.gmra.mrb[28].mxu1 %vm1075_vm8, %v1642_v61 }
 0x749   : > { %3510 = vmatpush3.bf16.msra.mxu1 %v1784_v63  ;;  %3515 = vmatprep.mubr.msk.bf16.mxu1 %vm3812_vm4, %v3810_v4  ;;  %v3708_v63 = vld [vmem:[%s3997_s5 + $0x8] sm:$0xff]  }
 0x74a   : > { %3511 = vmatprep.subr.bf16.mxu1 %v3810_v4 }
 0x74d   : > { %3512 = vmatpush3.bf16.msra.mxu1 %v1786_v55  ;;  %v3707_v55 = vld [vmem:[%s3997_s5] sm:$0xff]  }
 0x74e   : > { %3513 = vmatprep.subr.bf16.mxu1 %v3810_v4 }
 0x751   : > { %3514 = vmatpush3.bf16.msra.mxu1 %v1795_v6  ;;  %v3713_v6 = vld [vmem:[%s4007_s8 + $0x20] sm:$0xff]  }
 0x752   : > { %3519 = vmatprep.subr.bf16.mxu1 %v3810_v4 }
 0x754   : > { %3516 = vmatmul.mubr.msk.bf16.vlgmr.msra.gmra.mrb[32].mxu1 %vm995_vm7, %v1779_v10  ;;  %vm3819_vm7 = vmmov (!%p3280_p5), 0  }
 0x755   : > { %3520 = vmatpush3.bf16.msra.mxu1 %v4250_v13  ;;  %3523 = vmatprep.mubr.msk.bf16.mxu1 %vm3812_vm4, %v3810_v4 }
 0x756   : > { %3521 = vmatprep.subr.bf16.mxu1 %v3810_v4 }
 0x759   : > { %3522 = vmatpush3.bf16.msra.mxu1 %v4264_v32 }
 0x81b   : > { %v1680_v17 = vpop.f32.mrb[28].mxu1 }
 0x81c   : > { %v1687_v20 = vadd.f32 %v1680_v17, %v1494_v15  ;;  %v3497_v5 = vpop.f32.mrb[29].mxu1 }
 0x81d   : > { %v1683_v21 = vpop.f32.mrb[30].mxu1  ;;  %v3716_v5 = vld [vmem:[%s4007_s8 + $0x38] sm:$0xff]  }
 0x81e   : > { %v1688_v14 = vadd.f32 %v1683_v21, %v1497_v18  ;;  %v3498_v13 = vpop.f32.mrb[31].mxu1  ;;  %v3714_v18 = vld [vmem:[%s4007_s8 + $0x28] sm:$0xff]   ;;  %v3257_v21 = vld [vmem:[%s846_s23] ss:$0 sm:$0xff] }
 0x827   : > { %v1831_v16 = vpop.f32.mrb[32].mxu1 }
 0x828   : > { %v3517_v22 = vpop.f32.mrb[33].mxu1 }
 0x829   : > { %v1834_v23 = vpop.f32.mrb[34].mxu1 }
 0x82a   : > { %v1838_v25 = vpack.c.bf16 %v1834_v23, %v1831_v16  ;;  %v3518_v26 = vpop.f32.mrb[35].mxu1 }
 0x82c   : > { %3524 = vmatmul.mubr.msk.bf16.vlgmr.msra.gmra.mrb[36].mxu1 %vm1075_vm8, %v1838_v25 }
 0x82d   : > { %3548 = vmatprep.mubr.msk.f32.mxu1 %vm1974_vm3, %v4334_v40 }
 0x8ff   : > { %v1876_v27 = vpop.f32.mrb[36].mxu1 }
 0x900   : > { %v1883_v28 = vadd.f32 %v1876_v27, %v1687_v20  ;;  %v3525_v29 = vpop.f32.mrb[37].mxu1  ;;  %v3715_v20 = vld [vmem:[%s4007_s8 + $0x30] sm:$0xff]   ;;  %s3823_s8 = smov (!%p3280_p5), 32  }
 0x901   : > { %v1879_v30 = vpop.f32.mrb[38].mxu1 }
 0x902   : > { %v1884_v31 = vadd.f32 %v1879_v30, %v1688_v14  ;;  %v3526_v32 = vpop.f32.mrb[39].mxu1  ;;  %v1889_v33 = vadd.f32 %v1883_v28, %v4020_v2 }
 0x904   : > { %v1890_v34 = vadd.f32 %v1884_v31, %v4022_v3  ;;  %v3261_v31 = vld [vmem:[%s854_s12] ss:$0 sm:$0xff] }
 0x906   : > { %v3622_v38 = vpack.c.bf16 %v1890_v34, %v1889_v33 }
 0x908   : > { %3624 = vmatpush3.bf16.msk.msra.mxu0 %vm4317_vm1, %v3622_v38 }
 0x90b   : > { %3532 = vmatmul.mubr.msk.f32.vlgmr.msra.gmra.mrb[44].mxu0 %vm901_vm5, %v4326_v36 }
 0x90c   : > { %3536 = vmatprep.mubr.msk.f32.mxu0 %vm1974_vm3, %v4334_v40 }
 0x9de   : > { %v1964_v2 = vpop.f32.mrb[44].mxu0 }
 0x9df   : > { %v3533_v3 = vpop.f32.mrb[45].mxu0  ;;  %v1969_v39 = vsel %vm1968_vm2, %v1964_v2, 0.0 }
 0x9e0   : > { %1970 = vadd.xlane.f32.xlu0 %v1969_v39 }
 0xa6d   : > { %v1971_v43 = vpop.xlane.xlu0 %1970 }
 0xa6e   : > { %v1973_v44 = vmul.f32 %v4343_v42, %v1971_v43 }
 0xa70   : > { %3534 = vmatprep.subr.msk.mxu0 %vm1981_vm6, %v1973_v44 }
 0xa71   : > { %3535 = vmatpush3.msk.msra.mxu0 %vm1981_vm6, %v1973_v44 }
 0xa72   : > { %3537 = vmatmul.mubr.msk.f32.vlgmr.msra.gmra.mrb[46].mxu0 %vm1974_vm3, %v4349_v45  ;;  %3625 = vmatprep.subr.bf16.mxu0 %v3816_v24 }
 0xa73   : > { %3543 = vmatprep.mubr.msk.f32.mxu0 %vm3812_vm4, %v3810_v4 }
 0xb45   : > { %v3538_v46 = vpop.f32.mrb[46].mxu0 }
 0xb46   : > { %v2051_v47 = vpop.f32.mrb[47].mxu0 }
 0xb47   : > { %2062 = vperm.xlu1 %3683, %v2051_v47  }
 0xb4b   : > { %2067 = vperm.xlu1 %3683, %v3538_v46  }
 0xbc6   : > { %v2063_v48 = vpop.permute.xlu1 %2062 }
 0xbc7   : > { %v2070_v7 = vsub.f32 %v1889_v33, %v2063_v48 }
 0xbc9   : > { %v2072_v49 = vmul.f32 %v2070_v7, %v2070_v7 }
 0xbca   : > { %v2068_v19 = vpop.permute.xlu1 %2067 }
 0xbcb   : > { %v2071_v35 = vsub.f32 %v1890_v34, %v2068_v19 }
 0xbcd   : > { %v2073_v50 = vmul.f32 %v2071_v35, %v2071_v35 }
 0xbcf   : > { %v3626_v51 = vpack.c.bf16 %v2073_v50, %v2072_v49 }
 0xbd1   : > { %3628 = vmatpush3.bf16.msk.msra.mxu0 %vm4317_vm1, %v3626_v51 }
 0xbd2   : > { %3551 = vmatprep.subr.bf16.mxu0 %v3810_v4 }
 0xbd4   : > { %3544 = vmatmul.mubr.msk.f32.vlgmr.msra.gmra.mrb[48].mxu0 %vm901_vm5, %v4326_v36 }
 0xbd5   : > { %3555 = vmatprep.mubr.msk.bf16.mxu0 %vm3812_vm4, %v3810_v4  ;;  %3552 = vmatpush3.bf16.msra.mxu0 %v3707_v55 }
 0xbd6   : > { %3553 = vmatprep.subr.bf16.mxu0 %v3810_v4 }
 0xbd9   : > { %3554 = vmatpush3.bf16.msra.mxu0 %v3708_v63 }
 0xbda   : > { %3629 = vmatprep.subr.bf16.mxu0 %v3816_v24 }
 0xca7   : > { %v2143_v53 = vpop.f32.mrb[48].mxu0 }
 0xca8   : > { %v3545_v56 = vpop.f32.mrb[49].mxu0  ;;  %v2147_v57 = vsel %vm1968_vm2, %v2143_v53, 0.0 }
 0xca9   : > { %2148 = vadd.xlane.f32.xlu1 %v2147_v57 }
 0xd36   : > { %v2149_v58 = vpop.xlane.xlu1 %2148 }
 0xd37   : > { %v2150_v11 = vmul.f32 %v4343_v42, %v2149_v58 }
 0xd39   : > { %v2151_v59 = vadd.f32 1e-05, %v2150_v11 }
 0xd3b   : > { %3735 = vrsqrt.f32 %v2151_v59 }
 0xd45   : > { %v3736_v54 = vpop.eup %3735 }
 0xd46   : > { %3546 = vmatprep.subr.msk.mxu1 %vm1981_vm6, %v3736_v54 }
 0xd47   : > { %3547 = vmatpush3.msk.msra.mxu1 %vm1981_vm6, %v3736_v54 }
 0xd48   : > { %3549 = vmatmul.mubr.msk.f32.vlgmr.msra.gmra.mrb[40].mxu1 %vm1974_vm3, %v4349_v45  ;;  %3559 = vmatprep.subr.bf16.mxu1 %v3810_v4 }
 0xd49   : > { %3575 = vmatprep.mubr.msk.bf16.mxu1 %vm3812_vm4, %v3810_v4  ;;  %3560 = vmatpush3.bf16.msra.mxu1 %v3709_v60 }
 0xd4a   : > { %3561 = vmatprep.subr.bf16.mxu1 %v3810_v4 }
 0xd4d   : > { %3562 = vmatpush3.bf16.msra.mxu1 %v3710_v12 }
 0xd4e   : > { %3563 = vmatprep.subr.bf16.mxu1 %v3810_v4 }
 0xd51   : > { %3564 = vmatpush3.bf16.msra.mxu1 %v3711_v0  ;;  %v3818_v0 = vmov (!%p3280_p5), 0.0|0.0  }
 0xd52   : > { %3565 = vmatprep.subr.bf16.mxu1 %v3810_v4 }
 0xd55   : > { %3566 = vmatpush3.bf16.msra.mxu1 %v3712_v1  ;;  %v2775_v1 = vld [vmem:[%s4526_s11] sm:$0x3] (!%p3280_p5) }
 0xd56   : > { %3567 = vmatprep.subr.bf16.mxu1 %v3810_v4 }
 0xd59   : > { %3568 = vmatpush3.bf16.msra.mxu1 %v3713_v6  ;;  %v2832_v6 = vld [vmem:[%s4525_s10] sm:$0x3] (!%p3280_p5) }
 0xd5a   : > { %3569 = vmatprep.subr.bf16.mxu1 %v3810_v4 }
 0xd5d   : > { %3570 = vmatpush3.bf16.msra.mxu1 %v3714_v18 }
 0xd5e   : > { %3571 = vmatprep.subr.bf16.mxu1 %v3810_v4 }
 0xd61   : > { %3572 = vmatpush3.bf16.msra.mxu1 %v3715_v20 }
 0xd62   : > { %3573 = vmatprep.subr.bf16.mxu1 %v3810_v4 }
 0xd65   : > { %3574 = vmatpush3.bf16.msra.mxu1 %v3716_v5 }
 0xd66   : > { %3637 = vmatprep.subr.bf16.mxu1 (!%p3280_p5), %v3818_v0 }
 0xe1b   : > { %v3550_v61 = vpop.f32.mrb[40].mxu1 }
 0xe1c   : > { %2238 = vperm.xlu1 %3683, %v3550_v61   ;;  %v2222_v62 = vpop.f32.mrb[41].mxu1 }
 0xe1d   : > { %2233 = vperm.xlu0 %3684, %v2222_v62  }
 0xe9b   : > { %v2239_v8 = vpop.permute.xlu1 %2238 }
 0xe9c   : > { %v2242_v10 = vmul.f32 %v2239_v8, %v2071_v35  ;;  %v2234_v52 = vpop.permute.xlu0 %2233 }
 0xe9d   : > { %v2241_v15 = vmul.f32 %v2234_v52, %v2070_v7  ;;  %v2921_v52 = vld [vmem:[%s4584_s13] sm:$0xff] (!%p3280_p5) }
 0xe9f   : > { %v2247_v17 = vpack.c.bf16 %v2242_v10, %v2241_v15 }
 0xea1   : > { %3556 = vmatmul.mubr.msk.bf16.vlgmr.msra.gmra.mrb[52].mxu0 %vm1075_vm8, %v2247_v17 }
 0xea2   : > { %3583 = vmatprep.mubr.msk.f32.mxu0 %vm3812_vm4, %v3810_v4 }
 0xf74   : > { %v2304_v14 = vpop.f32.mrb[52].mxu0 }
 0xf75   : > { %v2305_v13 = vadd.f32 %v3257_v21, %v2304_v14  ;;  %v3557_v16 = vpop.f32.mrb[53].mxu0 }
 0xf76   : > { %v2307_v22 = vpop.f32.mrb[54].mxu0 }
 0xf77   : > { %v2311_v23 = vmul.f32 0.01, %v2305_v13  ;;  %v2308_v25 = vadd.f32 %v3257_v21, %v2307_v22  ;;  %v3558_v26 = vpop.f32.mrb[55].mxu0 }
 0xf79   : > { %v2312_v27 = vmul.f32 0.01, %v2308_v25  ;;  %v2313_v28 = vmax.f32 %v2305_v13, %v2311_v23 }
 0xf7b   : > { %v2314_v29 = vmax.f32 %v2308_v25, %v2312_v27 }
 0xf7d   : > { %v2331_v30 = vpack.c.bf16 %v2314_v29, %v2313_v28 }
 0xf7f   : > { %3576 = vmatmul.mubr.bf16.vlgmr.msra.gmra.mrb[44].mxu1 %v2331_v30 }
0x1052   : > { %v2421_v32 = vpop.f32.mrb[44].mxu1 }
0x1053   : > { %v2422_v33 = vadd.f32 %v3261_v31, %v2421_v32  ;;  %v3577_v34 = vpop.f32.mrb[45].mxu1 }
0x1054   : > { %v2424_v38 = vpop.f32.mrb[46].mxu1 }
0x1055   : > { %v2425_v2 = vadd.f32 %v3261_v31, %v2424_v38  ;;  %v3578_v3 = vpop.f32.mrb[47].mxu1  ;;  %v2428_v39 = vadd.f32 %v2422_v33, %v2241_v15  ;;  %v3821_v15 = vmov (!%p3280_p5), 0  }
0x1057   : > { %v2429_v41 = vadd.f32 %v2425_v2, %v2242_v10  ;;  %v2824_v10 = vld [vmem:[%s4583_s15] sm:$0x3] (!%p3280_p5) }
0x1059   : > { %v3630_v43 = vpack.c.bf16 %v2429_v41, %v2428_v39 }
0x105b   : > { %3632 = vmatpush3.bf16.msk.msra.mxu0 %vm4317_vm1, %v3630_v43 }
0x105e   : > { %3584 = vmatmul.mubr.msk.f32.vlgmr.msra.gmra.mrb[50].mxu0 %vm901_vm5, %v4326_v36 }
0x105f   : > { %3588 = vmatprep.mubr.msk.f32.mxu0 %vm1974_vm3, %v4334_v40 }
0x1131   : > { %v2499_v44 = vpop.f32.mrb[50].mxu0 }
0x1132   : > { %v2503_v46 = vsel %vm1968_vm2, %v2499_v44, 0.0  ;;  %v3585_v47 = vpop.f32.mrb[51].mxu0 }
0x1133   : > { %2504 = vadd.xlane.f32.xlu1 %v2503_v46 }
0x11c0   : > { %v2505_v48 = vpop.xlane.xlu1 %2504 }
0x11c1   : > { %v2506_v7 = vmul.f32 %v4343_v42, %v2505_v48 }
0x11c3   : > { %3586 = vmatprep.subr.msk.mxu0 %vm1981_vm6, %v2506_v7 }
0x11c4   : > { %3587 = vmatpush3.msk.msra.mxu0 %vm1981_vm6, %v2506_v7 }
0x11c5   : > { %3589 = vmatmul.mubr.msk.f32.vlgmr.msra.gmra.mrb[56].mxu0 %vm1974_vm3, %v4349_v45  ;;  %3633 = vmatprep.subr.bf16.mxu0 %v3816_v24 }
0x11c6   : > { %3595 = vmatprep.mubr.msk.f32.mxu0 %vm3812_vm4, %v3810_v4  ;;  %vm2769_vm4 = vcmask 256000  }
0x1298   : > { %v3590_v19 = vpop.f32.mrb[56].mxu0 }
0x1299   : > { %v2576_v35 = vpop.f32.mrb[57].mxu0 }
0x129a   : > { %2587 = vperm.xlu0 %3684, %v2576_v35  }
0x129e   : > { %2592 = vperm.xlu0 %3684, %v3590_v19  }
0x1319   : > { %v2588_v49 = vpop.permute.xlu0 %2587 }
0x131a   : > { %v2595_v50 = vsub.f32 %v2428_v39, %v2588_v49 }
0x131c   : > { %v2597_v56 = vmul.f32 %v2595_v50, %v2595_v50 }
0x131d   : > { %v2593_v51 = vpop.permute.xlu0 %2592 }
0x131e   : > { %v2596_v53 = vsub.f32 %v2429_v41, %v2593_v51 }
0x1320   : > { %v2598_v57 = vmul.f32 %v2596_v53, %v2596_v53 }
0x1322   : > { %v3634_v58 = vpack.c.bf16 %v2598_v57, %v2597_v56 }
0x1324   : > { %3636 = vmatpush3.bf16.msk.msra.mxu0 %vm4317_vm1, %v3634_v58 }
0x1327   : > { %3596 = vmatmul.mubr.msk.f32.vlgmr.msra.gmra.mrb[58].mxu0 %vm901_vm5, %v4326_v36 }
0x1328   : > { %3600 = vmatprep.mubr.msk.f32.mxu0 %vm1974_vm3, %v4334_v40 }
0x13fa   : > { %v2668_v4 = vpop.f32.mrb[58].mxu0 }
0x13fb   : > { %v2672_v24 = vsel %vm1968_vm2, %v2668_v4, 0.0  ;;  %v3597_v11 = vpop.f32.mrb[59].mxu0 }
0x13fc   : > { %2673 = vadd.xlane.f32.xlu0 %v2672_v24 }
0x1489   : > { %v2674_v59 = vpop.xlane.xlu0 %2673 }
0x148a   : > { %v2675_v54 = vmul.f32 %v4343_v42, %v2674_v59 }
0x148c   : > { %v2676_v55 = vadd.f32 1e-05, %v2675_v54 }
0x148e   : > { %3737 = vrsqrt.f32 %v2676_v55 }
0x1498   : > { %v3738_v61 = vpop.eup %3737 }
0x1499   : > { %3598 = vmatprep.subr.msk.mxu0 %vm1981_vm6, %v3738_v61 }
0x149a   : > { %3599 = vmatpush3.msk.msra.mxu0 %vm1981_vm6, %v3738_v61 }
0x149b   : > { %3601 = vmatmul.mubr.msk.f32.vlgmr.msra.gmra.mrb[60].mxu0 %vm1974_vm3, %v4349_v45  ;;  %v3820_v45 = vmov (!%p3280_p5), 0.0  }
0x149c   : > { %3613 = vmatprep.mubr.msk.f32.mxu1 (!%p3280_p5), %vm3819_vm7, %v3820_v45  ;;  %3603 = vmatprep.subr.bf16.mxu0 (!%p3280_p5), %v3820_v45 }
0x149d   : > { %3605 = vmatprep.mubr.msk.bf16.mxu0 (!%p3280_p5), %vm3819_vm7, %v3820_v45 }
0x156e   : > { %v3602_v36 = vpop.f32.mrb[60].mxu0 }
0x156f   : > { %2763 = vperm.xlu0 %3684, %v3602_v36   ;;  %v2747_v40 = vpop.f32.mrb[61].mxu0 }
0x1570   : > { %2758 = vperm.xlu1 %3683, %v2747_v40  }
0x1573   : > { %3739 = vset.pattern.permute.xlu0 (!%p3280_p5), %v3821_v15 }
0x1574   : > { %2827 = vperm.xlu0 (!%p3280_p5), %3739, %v2824_v10   ;;  %2914 = vrot.lane.b32.xlu1 (!%p3280_p5), %v2775_v1, %s3822_s26 }
0x15ec   : > { %2774 = sbr.rel (%p3280_p5) target bundleno = 5957 (0x1745), region = 116 }
0x15ee   : > { %v2764_v62 = vpop.permute.xlu0 %2763 }
0x15ef   : > { %v2767_v63 = vmul.f32 %v2764_v62, %v2596_v53  ;;  %v2759_v60 = vpop.permute.xlu1 %2758 }
0x15f0   : > { %v2766_v12 = vmul.f32 %v2759_v60, %v2595_v50 }
0x15f1   : > { %2770 = vst.msk [vmem:[#allocation2 + $0x8] sm:$0x7] %vm2769_vm4, %v2767_v63 }
0x15f2   : > { %2768 = vst.msk [vmem:[#allocation2] sm:$0xff] %vm1075_vm8, %v2766_v12  ;;  %v2777_v42 = vpack.c.bf16 (!%p3280_p5), %v2767_v63, %v2766_v12 }
0x15f3   : > { %v2828_v22 = vpop.permute.xlu0 %2827  ;;  %v2915_v26 = vpop.permute.xlu1 %2914 }
0x15f4   : > { %3640 = vmatpush3.bf16.msk.msra.mxu1 %vm4317_vm1, %v2777_v42  ;;  %v2782_v8 = vand.u32 %v2777_v42, %v4034_v9  ;;  %v2922_v9 = vld [vmem:[%s4584_s13 + $0x8] sm:$0x1]  ;;  %3740 = vrcp.f32 %v2828_v22 }
0x15f5   : > { %3616 = vmatprep.subr.msk.mxu1 %vm1981_vm6, %v2775_v1 }
0x15f6   : > { %3604 = vmatpush3.bf16.msra.mxu0 %v2782_v8 }
0x15f7   : > { %3614 = vmatmul.mubr.msk.f32.vlgmr.msra.gmra.mrb[0].mxu1 %vm901_vm5, %v2832_v6 }
0x15f8   : > { %3617 = vmatpush3.msk.msra.mxu1 %vm1981_vm6, %v2775_v1  ;;  %3618 = vmatprep.mubr.msk.f32.mxu1 %vm1974_vm3, %v2921_v52 }
0x15f9   : > { %3606 = vmatmul.mubr.msk.bf16.vlgmr.msra.gmra.mrb[0].mxu0 %vm901_vm5, %v2776_v37  ;;  %vm2919_vm5 = vcmask 779264  }
0x15fb   : > { %3619 = vmatmul.mubr.msk.f32.vlgmr.msra.gmra.mrb[2].mxu1 %vm1974_vm3, %v2922_v9 }
0x15fe   : > { %v3741_v23 = vpop.eup %3740 }
0x16ca   : > { %v2905_v17 = vpop.f32.mrb[0].mxu1 }
0x16cb   : > { %v3615_v18 = vpop.f32.mrb[1].mxu1  ;;  %2910 = vrot.lane.b32.xlu0 %v2905_v17, %s3823_s8 }
0x16cc   : > { %v2818_v20 = vpop.f32.mrb[0].mxu0 }
0x16cd   : > { %v3607_v5 = vpop.f32.mrb[1].mxu0  ;;  %v2831_v25 = vmul.f32 %v3741_v23, %v2818_v20 }
0x16ce   : > { %v3620_v21 = vpop.f32.mrb[2].mxu1  ;;  %v2821_v14 = vpop.f32.mrb[2].mxu0 }
0x16cf   : > { %v2997_v13 = vpop.f32.mrb[3].mxu1  ;;  %3010 = vrot.lane.b32.xlu0 %v3620_v21, %s3823_s8  ;;  %v3608_v16 = vpop.f32.mrb[3].mxu0 }
0x16d0   : > { %3008 = vrot.lane.b32.xlu1 %v2997_v13, %s3823_s8 }
0x173d   : > { %v2911_v27 = vpop.permute.xlu0 %2910 }
0x173e   : > { %v2917_v28 = vsel %vm1075_vm8, %v2831_v25, %v2911_v27 }
0x173f   : > { %v2918_v29 = vsel %vm1455_vm14, %v2917_v28, %v2915_v26 }
0x1740   : > { %2920 = vst.msk [vmem:[#allocation5] sm:$0x3] %vm2919_vm5, %v2918_v29 }
0x1741   : > { %v3011_v30 = vpop.permute.xlu0 %3010 }
0x1742   : > { %v3015_v31 = vsel %vm1075_vm8, %v2767_v63, %v3011_v30  ;;  %v3009_v32 = vpop.permute.xlu1 %3008 }
0x1743   : > { %3018 = vst.msk [vmem:[#allocation3 + $0x8] sm:$0x1] %vm3017_vm9, %v3015_v31  ;;  %v3014_v33 = vsel %vm1075_vm8, %v2766_v12, %v3009_v32 }
0x1744   : > { %3016 = vst.msk [vmem:[#allocation3] sm:$0xff] %vm1455_vm14, %v3014_v33 }
0x1745 PF: > { %p3653_p6 = scmp.eq.s32.totalorder %s3954_s30, 2  ;;  %s3824_s24 = smov [#allocation3]  }
0x1746   : > { %s3025_s23 = sshll.u32 %s3824_s24, 4  ;;  %s3026_s23 = int_to_ptr.vmem [resolvable:$true] %s3025_s23 }
0x1747   : > { %s3742_s12 = scalar_lea.vmem %s3026_s23, 256  ;;  %p3749_p10 = scmp.lt.s32.totalorder %s3026_s23, %s3026_s23 }
0x1748   : > { %p3743_p7 = scmp.ne.s32.totalorder %s3026_s23, %s3742_s12  ;;  %p3750_p11 = scmp.lt.s32.totalorder %s3742_s12, %s3742_s12 }
0x174a   : > { %p3744_p8 = pnand %p3743_p7, %p3653_p6  ;;  %p3751_p12 = por %p3750_p11, %p3749_p10 }
0x174c   : > { %p3745_p9 = pneg %p3744_p8 }
0x174e   : > { %p3752_p13 = pnand %p3751_p12, %p3745_p9 }
0x1750   : > { %3755 = shalt.err (!%p3752_p13)
}
0x1751   : > { %s4586_s14 = sld [smem:[#allocation24_spill]] }
0x1757   : > { %s3756_s15 = scalar_lea.hbm %s4586_s14, 256 }
0x1758   : > { %p3757_p0 = scmp.ne.s32.totalorder %s4586_s14, %s3756_s15  ;;  %p3762_p3 = scmp.lt.u32.totalorder %s3756_s15, %s4586_s14 }
0x175a   : > { %p3758_p1 = pnand %p3757_p0, %p3653_p6 }
0x175c   : > { %p3759_p2 = pneg %p3758_p1 }
0x175e   : > { %p3764_p4 = pnand %p3762_p3, %p3759_p2 }
0x1760   : > { %3767 = shalt.err (!%p3764_p4)
}
0x1761   : > { %s3825_s7 = smov 128   ;;  %s3826_s5 = smov 8  }
0x1762   : > { %3646 = dma.vmem_to_hbm [thread:$0]  (%p3653_p6), %s3026_s23, 256, %s4586_s14, [#allocation4], %s3825_s7, %s3825_s7, %s3826_s5  }
0x1763   : > { %s3827_s8 = smov [#allocation5]  }
0x1764   : > { %s3039_s24 = sshll.u32 %s3827_s8, 4  ;;  %s3040_s24 = int_to_ptr.vmem [resolvable:$true] %s3039_s24 }
0x1765   : > { %s3768_s12 = scalar_lea.vmem %s3040_s24, 32  ;;  %p3775_p9 = scmp.lt.s32.totalorder %s3040_s24, %s3040_s24 }
0x1766   : > { %p3769_p5 = scmp.ne.s32.totalorder %s3040_s24, %s3768_s12  ;;  %p3776_p10 = scmp.lt.s32.totalorder %s3768_s12, %s3768_s12 }
0x1768   : > { %p3770_p7 = pnand %p3769_p5, %p3653_p6  ;;  %p3777_p11 = por %p3776_p10, %p3775_p9 }
0x176a   : > { %p3771_p8 = pneg %p3770_p7 }
0x176c   : > { %p3778_p12 = pnand %p3777_p11, %p3771_p8 }
0x176e   : > { %3781 = shalt.err (!%p3778_p12)
}
0x176f   : > { %s4587_s15 = sld [smem:[#allocation25_spill]] }
0x1775   : > { %s3782_s4 = scalar_lea.hbm %s4587_s15, 32 }
0x1776   : > { %p3783_p13 = scmp.ne.s32.totalorder %s4587_s15, %s3782_s4  ;;  %p3788_p2 = scmp.lt.u32.totalorder %s3782_s4, %s4587_s15 }
0x1778   : > { %p3784_p0 = pnand %p3783_p13, %p3653_p6 }
0x177a   : > { %p3785_p1 = pneg %p3784_p0 }
0x177c   : > { %p3790_p3 = pnand %p3788_p2, %p3785_p1 }
0x177e   : > { %3793 = shalt.err (!%p3790_p3)
}
0x177f   : > { %3648 = dma.vmem_to_hbm [thread:$0]  (%p3653_p6), %s3040_s24, 32, %s4587_s15, [#allocation6]  }
0x1780   : > { %3799 = dma.done.wait (%p3653_p6), [#allocation4], 256  }
0x1781   : > { %3801 = vsyncadd (%p3653_p6), [#allocation4], 4294967040 }
0x1782   : > { %3803 = dma.done.wait (%p3653_p6), [#allocation6], 32  }
0x1783   : > { %3805 = vsyncadd (%p3653_p6), [#allocation6], 4294967264 }
0x1784 PF: > { %s4588_s3 = sld [smem:[#allocation9_spill]] }
0x178a   : > { %s36_s4 = sadd.s32 1, %s4588_s3  }
0x178b   : > { %p33_p4 = scmp.ge.s32.totalorder %s36_s4, 5  }
0x178d   :  { %35 = sbr.rel (!%p33_p4) target bundleno = 19 (0x13), region = 178 }
0x1794   :  { %3056 = vsyncpa [#allocation4], 1 }
0x1795   :  { %3058 = vsyncpa [#allocation4 + $0x1], 1 }
0x1796   :  { %3059 = vsyncpa [#allocation6], 1 }

</bundles_post_ra>
